<compile_context>
chip_gen: v7x
topology: tpu7x:2x2x1
jax: 0.10.0
libtpu: 0.0.40
codegen_flags: <defaults>
</compile_context>

<pallas_src>
import jax
import jax.numpy as jnp
from jax import lax
from jax.experimental import pallas as pl
from jax.experimental.pallas import tpu as pltpu


# ----------------------------- Pallas kernel ---------------------------------

def _make_fused_cnn_kernel(W, k, n_blocks, n_convs, layer_cins, Cout, Cmax, NL, needed):
    """Fused CNN forward for one group of images: all layers, residuals, ReLUs."""
    p = k // 2
    center = p * k + p

    def kernel(x_ref, mask_ref, wf_ref, pb_ref, *out_refs):
        act = x_ref[0]                                    # (Cin0, NL), lane-dense f32
        li = 0
        for blk in range(n_blocks):
            block_in = act
            for cv in range(n_convs):
                cin = layer_cins[li]
                pb_l = pb_ref[li]                          # (Cout, 1), db already folded

                # Center tap: no shift, no mask.
                w_full = wf_ref[li, center]                # (Cout, Cmax)
                w_c = w_full if cin == Cmax else w_full[:, :cin]
                acc = jnp.dot(w_c, act, preferred_element_type=jnp.float32) + pb_l

                # Remaining k*k-1 taps: XLU lane roll + MXU matmul + lane-mask the result.
                for ky in range(k):
                    for kx in range(k):
                        t = ky * k + kx
                        if t == center:
                            continue
                        delta = (ky - p) * W + (kx - p)    # flat-index tap offset
                        shift = (-delta) % NL              # roll so tap[i] = act[i+delta]
                        tap = pltpu.roll(act, shift=shift, axis=1)     # (cin, NL)
                        w_full = wf_ref[li, t]                          # (Cout, Cmax)
                        w_t = w_full if cin == Cmax else w_full[:, :cin]
                        contrib = jnp.dot(w_t, tap,
                                          preferred_element_type=jnp.float32)
                        # Masking per lane commutes with the channel contraction, so it
                        # is applied to the small (Cout, NL) result, not the tap.
                        acc = acc + contrib * mask_ref[t]               # (Cout, NL)

                last = (cv == n_convs - 1)
                if last and blk != 0:
                    acc = acc + block_in                   # residual add (blocks > 0)
                act = jnp.maximum(acc, 0.0)                # ReLU
                li += 1

            if blk in needed:
                out_refs[needed.index(blk)][0] = act.astype(out_refs[needed.index(blk)].dtype)

    return kernel


# ------------------------------ Pallas wrapper ---------------------------------

def convcnp_cnn_forward_pallas(x, params, layer_id=-1):
    """Fused forward. x: (B, 2F, H, W) NCHW.  params: list of blocks, each a list of
    (dw (Cin,k,k), db (Cin,), pw (Cout,Cin), pb (Cout,)) layer tuples."""
    B, Cin0, H, W = x.shape
    n_blocks = len(params)
    n_convs = len(params[0])
    k = params[0][0][0].shape[-1]
    Cout = params[0][0][2].shape[0]
    p = k // 2
    HW = H * W
    kk = k * k

    # Which block outputs does the caller actually need?
    if isinstance(layer_id, int):
        req = [layer_id if layer_id >= 0 else n_blocks + layer_id]
    elif isinstance(layer_id, list):
        req = [i if i >= 0 else n_blocks + i for i in layer_id]
    else:
        raise RuntimeError("layer_id must be int or list")
    needed = sorted(set(req))

    # Batch folding: G parallel grid steps (keeps 2 TCs busy on v7x), B//G images folded
    # into the lane axis per step (lane occupancy / overhead win on v5e/v6e when B>2).
    G = 2 if (B >= 2 and B % 2 == 0) else 1
    ips = B // G                      # images per grid step
    NL = ips * HW                     # lane width per step

    layers = [lw for blk in params for lw in blk]
    layer_cins = tuple(lw[0].shape[0] for lw in layers)
    Cmax = max(layer_cins)
    n_layers = len(layers)

    # Fold depthwise weights into the pointwise matrix per tap, zero-padded to Cmax:
    #   wf[li, t, o, c] = pw[o, c] * dw[c, t]
    # and fold the depthwise bias into the pointwise bias: pb' = pb + pw @ db.
    wf = jnp.zeros((n_layers, kk, Cout, Cmax), jnp.float32)
    pb_p = jnp.zeros((n_layers, Cout, 1), jnp.float32)
    for li, (dw, db, pw, pb) in enumerate(layers):
        cin = dw.shape[0]
        dwf = dw.reshape(cin, kk)                                   # (cin, kk)
        w_taps = pw[None, :, :] * dwf.T[:, None, :]                 # (kk, Cout, cin)
        wf = wf.at[li, :, :, :cin].set(w_taps)
        pb_p = pb_p.at[li, :, 0].set(pb + pw @ db)

    # Combined (vertical AND horizontal) SAME-padding validity masks per tap, periodic
    # in HW so they tile across folded images; pre-broadcast to (kk, Cout, NL) so the
    # kernel never emits a broadcast_in_dim for them.
    pos = jnp.arange(HW, dtype=jnp.int32)
    r, c = pos // W, pos % W
    rows = []
    for ky in range(k):
        for kx in range(k):
            rr, cc = r + (ky - p), c + (kx - p)
            rows.append(((rr >= 0) & (rr < H) & (cc >= 0) & (cc < W)).astype(jnp.float32))
    mask = jnp.stack(rows, axis=0)                                  # (kk, HW)
    mask = jnp.tile(mask, (1, ips))                                 # (kk, NL)
    mask_b = jnp.broadcast_to(mask[:, None, :], (kk, Cout, NL))     # (kk, Cout, NL)

    # Lane-dense activations: fold (image, H*W) into the lane axis, image-major.
    x_flat = x.reshape(G, ips, Cin0, HW).transpose(0, 2, 1, 3).reshape(G, Cin0, NL)

    kernel = _make_fused_cnn_kernel(W, k, n_blocks, n_convs, layer_cins,
                                    Cout, Cmax, NL, needed)

    out_shapes = tuple(jax.ShapeDtypeStruct((G, Cout, NL), jnp.float32)
                       for _ in needed)
    out_specs = tuple(pl.BlockSpec((1, Cout, NL), lambda g: (g, 0, 0))
                      for _ in needed)
    in_specs = [
        pl.BlockSpec((1, Cin0, NL), lambda g: (g, 0, 0)),
        pl.BlockSpec((kk, Cout, NL), lambda g: (0, 0, 0)),
        pl.BlockSpec((n_layers, kk, Cout, Cmax), lambda g: (0, 0, 0, 0)),
        pl.BlockSpec((n_layers, Cout, 1), lambda g: (0, 0, 0)),
    ]

    outs = pl.pallas_call(
        kernel,
        out_shape=out_shapes,
        grid=(G,),
        in_specs=in_specs,
        out_specs=out_specs,
        compiler_params=pltpu.CompilerParams(
            dimension_semantics=("parallel",)),
    )(x_flat, mask_b, wf, pb_p)

    # Unfold lanes back to (B, Cout, H, W) for the blocks we produced.
    block_out = {}
    for o, blk in zip(outs, needed):
        block_out[blk] = (o.reshape(G, Cout, ips, H, W)
                           .transpose(0, 2, 1, 3, 4)
                           .reshape(B, Cout, H, W))

    if isinstance(layer_id, int):
        return block_out[req[0]]
    return [block_out[i] for i in req]


# ------------------------------- parameters ------------------------------------

def init_params(key, num_of_filters, kernel_size_cnn, num_residual_blocks,
                num_convolutions_per_block):
    """Deterministic synthetic parameters mirroring the PyTorch module's shapes (NCHW)."""
    params = []
    F = num_of_filters
    k = kernel_size_cnn
    for i in range(num_residual_blocks):
        block = []
        for j in range(num_convolutions_per_block):
            cin = 2 * F if (i == 0 and j == 0) else F
            cout = F
            key, k1, k2, k3, k4 = jax.random.split(key, 5)
            dw = jax.random.normal(k1, (cin, k, k), jnp.float32) * 0.1   # depthwise weight
            db = jax.random.normal(k2, (cin,), jnp.float32) * 0.1        # depthwise bias
            pw = jax.random.normal(k3, (cout, cin), jnp.float32) * 0.1   # pointwise weight
            pb = jax.random.normal(k4, (cout,), jnp.float32) * 0.1       # pointwise bias
            block.append((dw, db, pw, pb))
        params.append(block)
    return params


# -------------------------------- reference ------------------------------------

def convcnp_cnn_forward_ref(x, params, layer_id=-1):
    """Pure-JAX NCHW reference of the module's forward (for correctness checking)."""
    n_blocks = len(params)
    outs = []
    for i in range(n_blocks):
        block_in = x
        y = x
        n_convs = len(params[i])
        for j, (dw, db, pw, pb) in enumerate(params[i]):
            cin = dw.shape[0]
            cout = pw.shape[0]
            kk = dw.shape[-1]
            ydw = lax.conv_general_dilated(
                y, dw.reshape(cin, 1, kk, kk), (1, 1), 'SAME',
                dimension_numbers=('NCHW', 'OIHW', 'NCHW'),
                feature_group_count=cin) + db.reshape(1, cin, 1, 1)
            y = jnp.einsum('bchw,oc->bohw', ydw, pw) + pb.reshape(1, cout, 1, 1)
            if j == n_convs - 1:
                if i != 0:
                    y = y + block_in
                y = jnp.maximum(y, 0.0)
            else:
                y = jnp.maximum(y, 0.0)
        x = y
        outs.append(x)
    if isinstance(layer_id, int):
        return outs[layer_id]
    return [outs[i] for i in layer_id]


# ----------------------------------- main ---------------------------------------

if __name__ == "__main__":
    # Small config: num_of_filters=8, kernel_size_CNN=3,
    # num_residual_blocks=2, num_convolutions_per_block=2
    F, K, NBLOCKS, NCONVS = 8, 3, 2, 2
    B, H, W = 2, 16, 16
    CIN = 2 * F                                # first-block input channels

    key = jax.random.PRNGKey(0)
    key, xkey = jax.random.split(key)
    x = jax.random.normal(xkey, (B, CIN, H, W), jnp.float32)   # NCHW input
    params = init_params(key, F, K, NBLOCKS, NCONVS)

    # Default path: last block only.
    out = convcnp_cnn_forward_pallas(x, params, layer_id=-1)
    out = jax.block_until_ready(out)
    ref = convcnp_cnn_forward_ref(x, params, layer_id=-1)
    ref = jax.block_until_ready(ref)
    assert out.shape == (B, F, H, W), out.shape
    assert jnp.allclose(out, ref, rtol=1e-4, atol=1e-4), \
        float(jnp.max(jnp.abs(out - ref)))

    # Multi-output path: all blocks requested.
    outs = convcnp_cnn_forward_pallas(x, params, layer_id=[0, 1])
    refs = convcnp_cnn_forward_ref(x, params, layer_id=[0, 1])
    for o, r in zip(outs, refs):
        o = jax.block_until_ready(o)
        assert jnp.allclose(o, r, rtol=1e-4, atol=1e-4), \
            float(jnp.max(jnp.abs(o - r)))

    print("KERNEL_OK")
</pallas_src>

<mosaic_0001>
module attributes {stable_mosaic.version = 11 : i64} {
  func.func @kernel(%arg0: i32, %arg1: memref<1x16x256xf32, #tpu.memory_space<vmem>>, %arg2: memref<9x8x256xf32, #tpu.memory_space<vmem>>, %arg3: memref<4x9x8x16xf32, #tpu.memory_space<vmem>>, %arg4: memref<4x8x1xf32, #tpu.memory_space<vmem>>, %arg5: memref<1x8x256xf32, #tpu.memory_space<vmem>>) attributes {dimension_semantics = [#tpu.dimension_semantics<parallel>], iteration_bounds = array<i64: 2>, scalar_prefetch = 0 : i64, scratch_operands = 0 : i64, tpu.core_type = #tpu.core_type<tc>, window_params = [{transform_indices = @transform_0, window_bounds = array<i64: 1, 16, 256>}, {pipeline_mode = #tpu.pipeline_mode<synchronous>, transform_indices = @transform_1, window_bounds = array<i64: 9, 8, 256>}, {pipeline_mode = #tpu.pipeline_mode<synchronous>, transform_indices = @transform_2, window_bounds = array<i64: 4, 9, 8, 16>}, {pipeline_mode = #tpu.pipeline_mode<synchronous>, transform_indices = @transform_3, window_bounds = array<i64: 4, 8, 1>}, {transform_indices = @transform_4, window_bounds = array<i64: 1, 8, 256>}]} {
    %c0 = arith.constant 0 : index
    %c0_0 = arith.constant 0 : index
    %c0_1 = arith.constant 0 : index
    %0 = vector.load %arg1[%c0, %c0_0, %c0_1] : memref<1x16x256xf32, #tpu.memory_space<vmem>>, vector<1x16x256xf32>
    %1 = vector.shape_cast %0 : vector<1x16x256xf32> to vector<16x256xf32>
    %c0_2 = arith.constant 0 : index
    %c0_3 = arith.constant 0 : index
    %c0_4 = arith.constant 0 : index
    %2 = vector.load %arg4[%c0_2, %c0_3, %c0_4] : memref<4x8x1xf32, #tpu.memory_space<vmem>>, vector<1x8x1xf32>
    %3 = vector.shape_cast %2 : vector<1x8x1xf32> to vector<8x1xf32>
    %c0_5 = arith.constant 0 : index
    %c4 = arith.constant 4 : index
    %c0_6 = arith.constant 0 : index
    %c0_7 = arith.constant 0 : index
    %4 = vector.load %arg3[%c0_5, %c4, %c0_6, %c0_7] : memref<4x9x8x16xf32, #tpu.memory_space<vmem>>, vector<1x1x8x16xf32>
    %5 = vector.shape_cast %4 : vector<1x1x8x16xf32> to vector<8x16xf32>
    %cst = arith.constant dense<0.000000e+00> : vector<8x256xf32>
    %6 = tpu.matmul %5, %1, %cst {dimension_numbers = #tpu.dot_dimension_numbers<[1], [0], [0], [1], [0, 0, 1, 1], [], []>} : vector<8x16xf32>, vector<16x256xf32>, vector<8x256xf32> -> vector<8x256xf32>
    %7 = vector.broadcast %3 : vector<8x1xf32> to vector<8x256xf32>
    %8 = arith.addf %6, %7 : vector<8x256xf32>
    %c17_i32 = arith.constant 17 : i32
    %9 = tpu.dynamic_rotate %1 by %c17_i32 dim 1 : vector<16x256xf32>, i32 -> vector<16x256xf32>
    %c0_8 = arith.constant 0 : index
    %c0_9 = arith.constant 0 : index
    %c0_10 = arith.constant 0 : index
    %c0_11 = arith.constant 0 : index
    %10 = vector.load %arg3[%c0_8, %c0_9, %c0_10, %c0_11] : memref<4x9x8x16xf32, #tpu.memory_space<vmem>>, vector<1x1x8x16xf32>
    %11 = vector.shape_cast %10 : vector<1x1x8x16xf32> to vector<8x16xf32>
    %cst_12 = arith.constant dense<0.000000e+00> : vector<8x256xf32>
    %12 = tpu.matmul %11, %9, %cst_12 {dimension_numbers = #tpu.dot_dimension_numbers<[1], [0], [0], [1], [0, 0, 1, 1], [], []>} : vector<8x16xf32>, vector<16x256xf32>, vector<8x256xf32> -> vector<8x256xf32>
    %c0_13 = arith.constant 0 : index
    %c0_14 = arith.constant 0 : index
    %c0_15 = arith.constant 0 : index
    %13 = vector.load %arg2[%c0_13, %c0_14, %c0_15] : memref<9x8x256xf32, #tpu.memory_space<vmem>>, vector<1x8x256xf32>
    %14 = vector.shape_cast %13 : vector<1x8x256xf32> to vector<8x256xf32>
    %15 = arith.mulf %12, %14 : vector<8x256xf32>
    %16 = arith.addf %8, %15 : vector<8x256xf32>
    %c16_i32 = arith.constant 16 : i32
    %17 = tpu.dynamic_rotate %1 by %c16_i32 dim 1 : vector<16x256xf32>, i32 -> vector<16x256xf32>
    %c0_16 = arith.constant 0 : index
    %c1 = arith.constant 1 : index
    %c0_17 = arith.constant 0 : index
    %c0_18 = arith.constant 0 : index
    %18 = vector.load %arg3[%c0_16, %c1, %c0_17, %c0_18] : memref<4x9x8x16xf32, #tpu.memory_space<vmem>>, vector<1x1x8x16xf32>
    %19 = vector.shape_cast %18 : vector<1x1x8x16xf32> to vector<8x16xf32>
    %cst_19 = arith.constant dense<0.000000e+00> : vector<8x256xf32>
    %20 = tpu.matmul %19, %17, %cst_19 {dimension_numbers = #tpu.dot_dimension_numbers<[1], [0], [0], [1], [0, 0, 1, 1], [], []>} : vector<8x16xf32>, vector<16x256xf32>, vector<8x256xf32> -> vector<8x256xf32>
    %c1_20 = arith.constant 1 : index
    %c0_21 = arith.constant 0 : index
    %c0_22 = arith.constant 0 : index
    %21 = vector.load %arg2[%c1_20, %c0_21, %c0_22] : memref<9x8x256xf32, #tpu.memory_space<vmem>>, vector<1x8x256xf32>
    %22 = vector.shape_cast %21 : vector<1x8x256xf32> to vector<8x256xf32>
    %23 = arith.mulf %20, %22 : vector<8x256xf32>
    %24 = arith.addf %16, %23 : vector<8x256xf32>
    %c15_i32 = arith.constant 15 : i32
    %25 = tpu.dynamic_rotate %1 by %c15_i32 dim 1 : vector<16x256xf32>, i32 -> vector<16x256xf32>
    %c0_23 = arith.constant 0 : index
    %c2 = arith.constant 2 : index
    %c0_24 = arith.constant 0 : index
    %c0_25 = arith.constant 0 : index
    %26 = vector.load %arg3[%c0_23, %c2, %c0_24, %c0_25] : memref<4x9x8x16xf32, #tpu.memory_space<vmem>>, vector<1x1x8x16xf32>
    %27 = vector.shape_cast %26 : vector<1x1x8x16xf32> to vector<8x16xf32>
    %cst_26 = arith.constant dense<0.000000e+00> : vector<8x256xf32>
    %28 = tpu.matmul %27, %25, %cst_26 {dimension_numbers = #tpu.dot_dimension_numbers<[1], [0], [0], [1], [0, 0, 1, 1], [], []>} : vector<8x16xf32>, vector<16x256xf32>, vector<8x256xf32> -> vector<8x256xf32>
    %c2_27 = arith.constant 2 : index
    %c0_28 = arith.constant 0 : index
    %c0_29 = arith.constant 0 : index
    %29 = vector.load %arg2[%c2_27, %c0_28, %c0_29] : memref<9x8x256xf32, #tpu.memory_space<vmem>>, vector<1x8x256xf32>
    %30 = vector.shape_cast %29 : vector<1x8x256xf32> to vector<8x256xf32>
    %31 = arith.mulf %28, %30 : vector<8x256xf32>
    %32 = arith.addf %24, %31 : vector<8x256xf32>
    %c1_i32 = arith.constant 1 : i32
    %33 = tpu.dynamic_rotate %1 by %c1_i32 dim 1 : vector<16x256xf32>, i32 -> vector<16x256xf32>
    %c0_30 = arith.constant 0 : index
    %c3 = arith.constant 3 : index
    %c0_31 = arith.constant 0 : index
    %c0_32 = arith.constant 0 : index
    %34 = vector.load %arg3[%c0_30, %c3, %c0_31, %c0_32] : memref<4x9x8x16xf32, #tpu.memory_space<vmem>>, vector<1x1x8x16xf32>
    %35 = vector.shape_cast %34 : vector<1x1x8x16xf32> to vector<8x16xf32>
    %cst_33 = arith.constant dense<0.000000e+00> : vector<8x256xf32>
    %36 = tpu.matmul %35, %33, %cst_33 {dimension_numbers = #tpu.dot_dimension_numbers<[1], [0], [0], [1], [0, 0, 1, 1], [], []>} : vector<8x16xf32>, vector<16x256xf32>, vector<8x256xf32> -> vector<8x256xf32>
    %c3_34 = arith.constant 3 : index
    %c0_35 = arith.constant 0 : index
    %c0_36 = arith.constant 0 : index
    %37 = vector.load %arg2[%c3_34, %c0_35, %c0_36] : memref<9x8x256xf32, #tpu.memory_space<vmem>>, vector<1x8x256xf32>
    %38 = vector.shape_cast %37 : vector<1x8x256xf32> to vector<8x256xf32>
    %39 = arith.mulf %36, %38 : vector<8x256xf32>
    %40 = arith.addf %32, %39 : vector<8x256xf32>
    %c255_i32 = arith.constant 255 : i32
    %41 = tpu.dynamic_rotate %1 by %c255_i32 dim 1 : vector<16x256xf32>, i32 -> vector<16x256xf32>
    %c0_37 = arith.constant 0 : index
    %c5 = arith.constant 5 : index
    %c0_38 = arith.constant 0 : index
    %c0_39 = arith.constant 0 : index
    %42 = vector.load %arg3[%c0_37, %c5, %c0_38, %c0_39] : memref<4x9x8x16xf32, #tpu.memory_space<vmem>>, vector<1x1x8x16xf32>
    %43 = vector.shape_cast %42 : vector<1x1x8x16xf32> to vector<8x16xf32>
    %cst_40 = arith.constant dense<0.000000e+00> : vector<8x256xf32>
    %44 = tpu.matmul %43, %41, %cst_40 {dimension_numbers = #tpu.dot_dimension_numbers<[1], [0], [0], [1], [0, 0, 1, 1], [], []>} : vector<8x16xf32>, vector<16x256xf32>, vector<8x256xf32> -> vector<8x256xf32>
    %c5_41 = arith.constant 5 : index
    %c0_42 = arith.constant 0 : index
    %c0_43 = arith.constant 0 : index
    %45 = vector.load %arg2[%c5_41, %c0_42, %c0_43] : memref<9x8x256xf32, #tpu.memory_space<vmem>>, vector<1x8x256xf32>
    %46 = vector.shape_cast %45 : vector<1x8x256xf32> to vector<8x256xf32>
    %47 = arith.mulf %44, %46 : vector<8x256xf32>
    %48 = arith.addf %40, %47 : vector<8x256xf32>
    %c241_i32 = arith.constant 241 : i32
    %49 = tpu.dynamic_rotate %1 by %c241_i32 dim 1 : vector<16x256xf32>, i32 -> vector<16x256xf32>
    %c0_44 = arith.constant 0 : index
    %c6 = arith.constant 6 : index
    %c0_45 = arith.constant 0 : index
    %c0_46 = arith.constant 0 : index
    %50 = vector.load %arg3[%c0_44, %c6, %c0_45, %c0_46] : memref<4x9x8x16xf32, #tpu.memory_space<vmem>>, vector<1x1x8x16xf32>
    %51 = vector.shape_cast %50 : vector<1x1x8x16xf32> to vector<8x16xf32>
    %cst_47 = arith.constant dense<0.000000e+00> : vector<8x256xf32>
    %52 = tpu.matmul %51, %49, %cst_47 {dimension_numbers = #tpu.dot_dimension_numbers<[1], [0], [0], [1], [0, 0, 1, 1], [], []>} : vector<8x16xf32>, vector<16x256xf32>, vector<8x256xf32> -> vector<8x256xf32>
    %c6_48 = arith.constant 6 : index
    %c0_49 = arith.constant 0 : index
    %c0_50 = arith.constant 0 : index
    %53 = vector.load %arg2[%c6_48, %c0_49, %c0_50] : memref<9x8x256xf32, #tpu.memory_space<vmem>>, vector<1x8x256xf32>
    %54 = vector.shape_cast %53 : vector<1x8x256xf32> to vector<8x256xf32>
    %55 = arith.mulf %52, %54 : vector<8x256xf32>
    %56 = arith.addf %48, %55 : vector<8x256xf32>
    %c240_i32 = arith.constant 240 : i32
    %57 = tpu.dynamic_rotate %1 by %c240_i32 dim 1 : vector<16x256xf32>, i32 -> vector<16x256xf32>
    %c0_51 = arith.constant 0 : index
    %c7 = arith.constant 7 : index
    %c0_52 = arith.constant 0 : index
    %c0_53 = arith.constant 0 : index
    %58 = vector.load %arg3[%c0_51, %c7, %c0_52, %c0_53] : memref<4x9x8x16xf32, #tpu.memory_space<vmem>>, vector<1x1x8x16xf32>
    %59 = vector.shape_cast %58 : vector<1x1x8x16xf32> to vector<8x16xf32>
    %cst_54 = arith.constant dense<0.000000e+00> : vector<8x256xf32>
    %60 = tpu.matmul %59, %57, %cst_54 {dimension_numbers = #tpu.dot_dimension_numbers<[1], [0], [0], [1], [0, 0, 1, 1], [], []>} : vector<8x16xf32>, vector<16x256xf32>, vector<8x256xf32> -> vector<8x256xf32>
    %c7_55 = arith.constant 7 : index
    %c0_56 = arith.constant 0 : index
    %c0_57 = arith.constant 0 : index
    %61 = vector.load %arg2[%c7_55, %c0_56, %c0_57] : memref<9x8x256xf32, #tpu.memory_space<vmem>>, vector<1x8x256xf32>
    %62 = vector.shape_cast %61 : vector<1x8x256xf32> to vector<8x256xf32>
    %63 = arith.mulf %60, %62 : vector<8x256xf32>
    %64 = arith.addf %56, %63 : vector<8x256xf32>
    %c239_i32 = arith.constant 239 : i32
    %65 = tpu.dynamic_rotate %1 by %c239_i32 dim 1 : vector<16x256xf32>, i32 -> vector<16x256xf32>
    %c0_58 = arith.constant 0 : index
    %c8 = arith.constant 8 : index
    %c0_59 = arith.constant 0 : index
    %c0_60 = arith.constant 0 : index
    %66 = vector.load %arg3[%c0_58, %c8, %c0_59, %c0_60] : memref<4x9x8x16xf32, #tpu.memory_space<vmem>>, vector<1x1x8x16xf32>
    %67 = vector.shape_cast %66 : vector<1x1x8x16xf32> to vector<8x16xf32>
    %cst_61 = arith.constant dense<0.000000e+00> : vector<8x256xf32>
    %68 = tpu.matmul %67, %65, %cst_61 {dimension_numbers = #tpu.dot_dimension_numbers<[1], [0], [0], [1], [0, 0, 1, 1], [], []>} : vector<8x16xf32>, vector<16x256xf32>, vector<8x256xf32> -> vector<8x256xf32>
    %c8_62 = arith.constant 8 : index
    %c0_63 = arith.constant 0 : index
    %c0_64 = arith.constant 0 : index
    %69 = vector.load %arg2[%c8_62, %c0_63, %c0_64] : memref<9x8x256xf32, #tpu.memory_space<vmem>>, vector<1x8x256xf32>
    %70 = vector.shape_cast %69 : vector<1x8x256xf32> to vector<8x256xf32>
    %71 = arith.mulf %68, %70 : vector<8x256xf32>
    %72 = arith.addf %64, %71 : vector<8x256xf32>
    %cst_65 = arith.constant 0.000000e+00 : f32
    %73 = vector.broadcast %cst_65 : f32 to vector<8x256xf32>
    %74 = arith.maximumf %72, %73 : vector<8x256xf32>
    %c1_66 = arith.constant 1 : index
    %c0_67 = arith.constant 0 : index
    %c0_68 = arith.constant 0 : index
    %75 = vector.load %arg4[%c1_66, %c0_67, %c0_68] : memref<4x8x1xf32, #tpu.memory_space<vmem>>, vector<1x8x1xf32>
    %76 = vector.shape_cast %75 : vector<1x8x1xf32> to vector<8x1xf32>
    %c1_69 = arith.constant 1 : index
    %c4_70 = arith.constant 4 : index
    %c0_71 = arith.constant 0 : index
    %c0_72 = arith.constant 0 : index
    %77 = vector.load %arg3[%c1_69, %c4_70, %c0_71, %c0_72] : memref<4x9x8x16xf32, #tpu.memory_space<vmem>>, vector<1x1x8x16xf32>
    %78 = vector.shape_cast %77 : vector<1x1x8x16xf32> to vector<8x16xf32>
    %79 = vector.extract_strided_slice %78 {offsets = [0, 0], sizes = [8, 8], strides = [1, 1]} : vector<8x16xf32> to vector<8x8xf32>
    %cst_73 = arith.constant dense<0.000000e+00> : vector<8x256xf32>
    %80 = tpu.matmul %79, %74, %cst_73 {dimension_numbers = #tpu.dot_dimension_numbers<[1], [0], [0], [1], [0, 0, 1, 1], [], []>} : vector<8x8xf32>, vector<8x256xf32>, vector<8x256xf32> -> vector<8x256xf32>
    %81 = vector.broadcast %76 : vector<8x1xf32> to vector<8x256xf32>
    %82 = arith.addf %80, %81 : vector<8x256xf32>
    %c17_i32_74 = arith.constant 17 : i32
    %83 = tpu.dynamic_rotate %74 by %c17_i32_74 dim 1 : vector<8x256xf32>, i32 -> vector<8x256xf32>
    %c1_75 = arith.constant 1 : index
    %c0_76 = arith.constant 0 : index
    %c0_77 = arith.constant 0 : index
    %c0_78 = arith.constant 0 : index
    %84 = vector.load %arg3[%c1_75, %c0_76, %c0_77, %c0_78] : memref<4x9x8x16xf32, #tpu.memory_space<vmem>>, vector<1x1x8x16xf32>
    %85 = vector.shape_cast %84 : vector<1x1x8x16xf32> to vector<8x16xf32>
    %86 = vector.extract_strided_slice %85 {offsets = [0, 0], sizes = [8, 8], strides = [1, 1]} : vector<8x16xf32> to vector<8x8xf32>
    %cst_79 = arith.constant dense<0.000000e+00> : vector<8x256xf32>
    %87 = tpu.matmul %86, %83, %cst_79 {dimension_numbers = #tpu.dot_dimension_numbers<[1], [0], [0], [1], [0, 0, 1, 1], [], []>} : vector<8x8xf32>, vector<8x256xf32>, vector<8x256xf32> -> vector<8x256xf32>
    %c0_80 = arith.constant 0 : index
    %c0_81 = arith.constant 0 : index
    %c0_82 = arith.constant 0 : index
    %88 = vector.load %arg2[%c0_80, %c0_81, %c0_82] : memref<9x8x256xf32, #tpu.memory_space<vmem>>, vector<1x8x256xf32>
    %89 = vector.shape_cast %88 : vector<1x8x256xf32> to vector<8x256xf32>
    %90 = arith.mulf %87, %89 : vector<8x256xf32>
    %91 = arith.addf %82, %90 : vector<8x256xf32>
    %c16_i32_83 = arith.constant 16 : i32
    %92 = tpu.dynamic_rotate %74 by %c16_i32_83 dim 1 : vector<8x256xf32>, i32 -> vector<8x256xf32>
    %c1_84 = arith.constant 1 : index
    %c1_85 = arith.constant 1 : index
    %c0_86 = arith.constant 0 : index
    %c0_87 = arith.constant 0 : index
    %93 = vector.load %arg3[%c1_84, %c1_85, %c0_86, %c0_87] : memref<4x9x8x16xf32, #tpu.memory_space<vmem>>, vector<1x1x8x16xf32>
    %94 = vector.shape_cast %93 : vector<1x1x8x16xf32> to vector<8x16xf32>
    %95 = vector.extract_strided_slice %94 {offsets = [0, 0], sizes = [8, 8], strides = [1, 1]} : vector<8x16xf32> to vector<8x8xf32>
    %cst_88 = arith.constant dense<0.000000e+00> : vector<8x256xf32>
    %96 = tpu.matmul %95, %92, %cst_88 {dimension_numbers = #tpu.dot_dimension_numbers<[1], [0], [0], [1], [0, 0, 1, 1], [], []>} : vector<8x8xf32>, vector<8x256xf32>, vector<8x256xf32> -> vector<8x256xf32>
    %c1_89 = arith.constant 1 : index
    %c0_90 = arith.constant 0 : index
    %c0_91 = arith.constant 0 : index
    %97 = vector.load %arg2[%c1_89, %c0_90, %c0_91] : memref<9x8x256xf32, #tpu.memory_space<vmem>>, vector<1x8x256xf32>
    %98 = vector.shape_cast %97 : vector<1x8x256xf32> to vector<8x256xf32>
    %99 = arith.mulf %96, %98 : vector<8x256xf32>
    %100 = arith.addf %91, %99 : vector<8x256xf32>
    %c15_i32_92 = arith.constant 15 : i32
    %101 = tpu.dynamic_rotate %74 by %c15_i32_92 dim 1 : vector<8x256xf32>, i32 -> vector<8x256xf32>
    %c1_93 = arith.constant 1 : index
    %c2_94 = arith.constant 2 : index
    %c0_95 = arith.constant 0 : index
    %c0_96 = arith.constant 0 : index
    %102 = vector.load %arg3[%c1_93, %c2_94, %c0_95, %c0_96] : memref<4x9x8x16xf32, #tpu.memory_space<vmem>>, vector<1x1x8x16xf32>
    %103 = vector.shape_cast %102 : vector<1x1x8x16xf32> to vector<8x16xf32>
    %104 = vector.extract_strided_slice %103 {offsets = [0, 0], sizes = [8, 8], strides = [1, 1]} : vector<8x16xf32> to vector<8x8xf32>
    %cst_97 = arith.constant dense<0.000000e+00> : vector<8x256xf32>
    %105 = tpu.matmul %104, %101, %cst_97 {dimension_numbers = #tpu.dot_dimension_numbers<[1], [0], [0], [1], [0, 0, 1, 1], [], []>} : vector<8x8xf32>, vector<8x256xf32>, vector<8x256xf32> -> vector<8x256xf32>
    %c2_98 = arith.constant 2 : index
    %c0_99 = arith.constant 0 : index
    %c0_100 = arith.constant 0 : index
    %106 = vector.load %arg2[%c2_98, %c0_99, %c0_100] : memref<9x8x256xf32, #tpu.memory_space<vmem>>, vector<1x8x256xf32>
    %107 = vector.shape_cast %106 : vector<1x8x256xf32> to vector<8x256xf32>
    %108 = arith.mulf %105, %107 : vector<8x256xf32>
    %109 = arith.addf %100, %108 : vector<8x256xf32>
    %c1_i32_101 = arith.constant 1 : i32
    %110 = tpu.dynamic_rotate %74 by %c1_i32_101 dim 1 : vector<8x256xf32>, i32 -> vector<8x256xf32>
    %c1_102 = arith.constant 1 : index
    %c3_103 = arith.constant 3 : index
    %c0_104 = arith.constant 0 : index
    %c0_105 = arith.constant 0 : index
    %111 = vector.load %arg3[%c1_102, %c3_103, %c0_104, %c0_105] : memref<4x9x8x16xf32, #tpu.memory_space<vmem>>, vector<1x1x8x16xf32>
    %112 = vector.shape_cast %111 : vector<1x1x8x16xf32> to vector<8x16xf32>
    %113 = vector.extract_strided_slice %112 {offsets = [0, 0], sizes = [8, 8], strides = [1, 1]} : vector<8x16xf32> to vector<8x8xf32>
    %cst_106 = arith.constant dense<0.000000e+00> : vector<8x256xf32>
    %114 = tpu.matmul %113, %110, %cst_106 {dimension_numbers = #tpu.dot_dimension_numbers<[1], [0], [0], [1], [0, 0, 1, 1], [], []>} : vector<8x8xf32>, vector<8x256xf32>, vector<8x256xf32> -> vector<8x256xf32>
    %c3_107 = arith.constant 3 : index
    %c0_108 = arith.constant 0 : index
    %c0_109 = arith.constant 0 : index
    %115 = vector.load %arg2[%c3_107, %c0_108, %c0_109] : memref<9x8x256xf32, #tpu.memory_space<vmem>>, vector<1x8x256xf32>
    %116 = vector.shape_cast %115 : vector<1x8x256xf32> to vector<8x256xf32>
    %117 = arith.mulf %114, %116 : vector<8x256xf32>
    %118 = arith.addf %109, %117 : vector<8x256xf32>
    %c255_i32_110 = arith.constant 255 : i32
    %119 = tpu.dynamic_rotate %74 by %c255_i32_110 dim 1 : vector<8x256xf32>, i32 -> vector<8x256xf32>
    %c1_111 = arith.constant 1 : index
    %c5_112 = arith.constant 5 : index
    %c0_113 = arith.constant 0 : index
    %c0_114 = arith.constant 0 : index
    %120 = vector.load %arg3[%c1_111, %c5_112, %c0_113, %c0_114] : memref<4x9x8x16xf32, #tpu.memory_space<vmem>>, vector<1x1x8x16xf32>
    %121 = vector.shape_cast %120 : vector<1x1x8x16xf32> to vector<8x16xf32>
    %122 = vector.extract_strided_slice %121 {offsets = [0, 0], sizes = [8, 8], strides = [1, 1]} : vector<8x16xf32> to vector<8x8xf32>
    %cst_115 = arith.constant dense<0.000000e+00> : vector<8x256xf32>
    %123 = tpu.matmul %122, %119, %cst_115 {dimension_numbers = #tpu.dot_dimension_numbers<[1], [0], [0], [1], [0, 0, 1, 1], [], []>} : vector<8x8xf32>, vector<8x256xf32>, vector<8x256xf32> -> vector<8x256xf32>
    %c5_116 = arith.constant 5 : index
    %c0_117 = arith.constant 0 : index
    %c0_118 = arith.constant 0 : index
    %124 = vector.load %arg2[%c5_116, %c0_117, %c0_118] : memref<9x8x256xf32, #tpu.memory_space<vmem>>, vector<1x8x256xf32>
    %125 = vector.shape_cast %124 : vector<1x8x256xf32> to vector<8x256xf32>
    %126 = arith.mulf %123, %125 : vector<8x256xf32>
    %127 = arith.addf %118, %126 : vector<8x256xf32>
    %c241_i32_119 = arith.constant 241 : i32
    %128 = tpu.dynamic_rotate %74 by %c241_i32_119 dim 1 : vector<8x256xf32>, i32 -> vector<8x256xf32>
    %c1_120 = arith.constant 1 : index
    %c6_121 = arith.constant 6 : index
    %c0_122 = arith.constant 0 : index
    %c0_123 = arith.constant 0 : index
    %129 = vector.load %arg3[%c1_120, %c6_121, %c0_122, %c0_123] : memref<4x9x8x16xf32, #tpu.memory_space<vmem>>, vector<1x1x8x16xf32>
    %130 = vector.shape_cast %129 : vector<1x1x8x16xf32> to vector<8x16xf32>
    %131 = vector.extract_strided_slice %130 {offsets = [0, 0], sizes = [8, 8], strides = [1, 1]} : vector<8x16xf32> to vector<8x8xf32>
    %cst_124 = arith.constant dense<0.000000e+00> : vector<8x256xf32>
    %132 = tpu.matmul %131, %128, %cst_124 {dimension_numbers = #tpu.dot_dimension_numbers<[1], [0], [0], [1], [0, 0, 1, 1], [], []>} : vector<8x8xf32>, vector<8x256xf32>, vector<8x256xf32> -> vector<8x256xf32>
    %c6_125 = arith.constant 6 : index
    %c0_126 = arith.constant 0 : index
    %c0_127 = arith.constant 0 : index
    %133 = vector.load %arg2[%c6_125, %c0_126, %c0_127] : memref<9x8x256xf32, #tpu.memory_space<vmem>>, vector<1x8x256xf32>
    %134 = vector.shape_cast %133 : vector<1x8x256xf32> to vector<8x256xf32>
    %135 = arith.mulf %132, %134 : vector<8x256xf32>
    %136 = arith.addf %127, %135 : vector<8x256xf32>
    %c240_i32_128 = arith.constant 240 : i32
    %137 = tpu.dynamic_rotate %74 by %c240_i32_128 dim 1 : vector<8x256xf32>, i32 -> vector<8x256xf32>
    %c1_129 = arith.constant 1 : index
    %c7_130 = arith.constant 7 : index
    %c0_131 = arith.constant 0 : index
    %c0_132 = arith.constant 0 : index
    %138 = vector.load %arg3[%c1_129, %c7_130, %c0_131, %c0_132] : memref<4x9x8x16xf32, #tpu.memory_space<vmem>>, vector<1x1x8x16xf32>
    %139 = vector.shape_cast %138 : vector<1x1x8x16xf32> to vector<8x16xf32>
    %140 = vector.extract_strided_slice %139 {offsets = [0, 0], sizes = [8, 8], strides = [1, 1]} : vector<8x16xf32> to vector<8x8xf32>
    %cst_133 = arith.constant dense<0.000000e+00> : vector<8x256xf32>
    %141 = tpu.matmul %140, %137, %cst_133 {dimension_numbers = #tpu.dot_dimension_numbers<[1], [0], [0], [1], [0, 0, 1, 1], [], []>} : vector<8x8xf32>, vector<8x256xf32>, vector<8x256xf32> -> vector<8x256xf32>
    %c7_134 = arith.constant 7 : index
    %c0_135 = arith.constant 0 : index
    %c0_136 = arith.constant 0 : index
    %142 = vector.load %arg2[%c7_134, %c0_135, %c0_136] : memref<9x8x256xf32, #tpu.memory_space<vmem>>, vector<1x8x256xf32>
    %143 = vector.shape_cast %142 : vector<1x8x256xf32> to vector<8x256xf32>
    %144 = arith.mulf %141, %143 : vector<8x256xf32>
    %145 = arith.addf %136, %144 : vector<8x256xf32>
    %c239_i32_137 = arith.constant 239 : i32
    %146 = tpu.dynamic_rotate %74 by %c239_i32_137 dim 1 : vector<8x256xf32>, i32 -> vector<8x256xf32>
    %c1_138 = arith.constant 1 : index
    %c8_139 = arith.constant 8 : index
    %c0_140 = arith.constant 0 : index
    %c0_141 = arith.constant 0 : index
    %147 = vector.load %arg3[%c1_138, %c8_139, %c0_140, %c0_141] : memref<4x9x8x16xf32, #tpu.memory_space<vmem>>, vector<1x1x8x16xf32>
    %148 = vector.shape_cast %147 : vector<1x1x8x16xf32> to vector<8x16xf32>
    %149 = vector.extract_strided_slice %148 {offsets = [0, 0], sizes = [8, 8], strides = [1, 1]} : vector<8x16xf32> to vector<8x8xf32>
    %cst_142 = arith.constant dense<0.000000e+00> : vector<8x256xf32>
    %150 = tpu.matmul %149, %146, %cst_142 {dimension_numbers = #tpu.dot_dimension_numbers<[1], [0], [0], [1], [0, 0, 1, 1], [], []>} : vector<8x8xf32>, vector<8x256xf32>, vector<8x256xf32> -> vector<8x256xf32>
    %c8_143 = arith.constant 8 : index
    %c0_144 = arith.constant 0 : index
    %c0_145 = arith.constant 0 : index
    %151 = vector.load %arg2[%c8_143, %c0_144, %c0_145] : memref<9x8x256xf32, #tpu.memory_space<vmem>>, vector<1x8x256xf32>
    %152 = vector.shape_cast %151 : vector<1x8x256xf32> to vector<8x256xf32>
    %153 = arith.mulf %150, %152 : vector<8x256xf32>
    %154 = arith.addf %145, %153 : vector<8x256xf32>
    %cst_146 = arith.constant 0.000000e+00 : f32
    %155 = vector.broadcast %cst_146 : f32 to vector<8x256xf32>
    %156 = arith.maximumf %154, %155 : vector<8x256xf32>
    %c2_147 = arith.constant 2 : index
    %c0_148 = arith.constant 0 : index
    %c0_149 = arith.constant 0 : index
    %157 = vector.load %arg4[%c2_147, %c0_148, %c0_149] : memref<4x8x1xf32, #tpu.memory_space<vmem>>, vector<1x8x1xf32>
    %158 = vector.shape_cast %157 : vector<1x8x1xf32> to vector<8x1xf32>
    %c2_150 = arith.constant 2 : index
    %c4_151 = arith.constant 4 : index
    %c0_152 = arith.constant 0 : index
    %c0_153 = arith.constant 0 : index
    %159 = vector.load %arg3[%c2_150, %c4_151, %c0_152, %c0_153] : memref<4x9x8x16xf32, #tpu.memory_space<vmem>>, vector<1x1x8x16xf32>
    %160 = vector.shape_cast %159 : vector<1x1x8x16xf32> to vector<8x16xf32>
    %161 = vector.extract_strided_slice %160 {offsets = [0, 0], sizes = [8, 8], strides = [1, 1]} : vector<8x16xf32> to vector<8x8xf32>
    %cst_154 = arith.constant dense<0.000000e+00> : vector<8x256xf32>
    %162 = tpu.matmul %161, %156, %cst_154 {dimension_numbers = #tpu.dot_dimension_numbers<[1], [0], [0], [1], [0, 0, 1, 1], [], []>} : vector<8x8xf32>, vector<8x256xf32>, vector<8x256xf32> -> vector<8x256xf32>
    %163 = vector.broadcast %158 : vector<8x1xf32> to vector<8x256xf32>
    %164 = arith.addf %162, %163 : vector<8x256xf32>
    %c17_i32_155 = arith.constant 17 : i32
    %165 = tpu.dynamic_rotate %156 by %c17_i32_155 dim 1 : vector<8x256xf32>, i32 -> vector<8x256xf32>
    %c2_156 = arith.constant 2 : index
    %c0_157 = arith.constant 0 : index
    %c0_158 = arith.constant 0 : index
    %c0_159 = arith.constant 0 : index
    %166 = vector.load %arg3[%c2_156, %c0_157, %c0_158, %c0_159] : memref<4x9x8x16xf32, #tpu.memory_space<vmem>>, vector<1x1x8x16xf32>
    %167 = vector.shape_cast %166 : vector<1x1x8x16xf32> to vector<8x16xf32>
    %168 = vector.extract_strided_slice %167 {offsets = [0, 0], sizes = [8, 8], strides = [1, 1]} : vector<8x16xf32> to vector<8x8xf32>
    %cst_160 = arith.constant dense<0.000000e+00> : vector<8x256xf32>
    %169 = tpu.matmul %168, %165, %cst_160 {dimension_numbers = #tpu.dot_dimension_numbers<[1], [0], [0], [1], [0, 0, 1, 1], [], []>} : vector<8x8xf32>, vector<8x256xf32>, vector<8x256xf32> -> vector<8x256xf32>
    %c0_161 = arith.constant 0 : index
    %c0_162 = arith.constant 0 : index
    %c0_163 = arith.constant 0 : index
    %170 = vector.load %arg2[%c0_161, %c0_162, %c0_163] : memref<9x8x256xf32, #tpu.memory_space<vmem>>, vector<1x8x256xf32>
    %171 = vector.shape_cast %170 : vector<1x8x256xf32> to vector<8x256xf32>
    %172 = arith.mulf %169, %171 : vector<8x256xf32>
    %173 = arith.addf %164, %172 : vector<8x256xf32>
    %c16_i32_164 = arith.constant 16 : i32
    %174 = tpu.dynamic_rotate %156 by %c16_i32_164 dim 1 : vector<8x256xf32>, i32 -> vector<8x256xf32>
    %c2_165 = arith.constant 2 : index
    %c1_166 = arith.constant 1 : index
    %c0_167 = arith.constant 0 : index
    %c0_168 = arith.constant 0 : index
    %175 = vector.load %arg3[%c2_165, %c1_166, %c0_167, %c0_168] : memref<4x9x8x16xf32, #tpu.memory_space<vmem>>, vector<1x1x8x16xf32>
    %176 = vector.shape_cast %175 : vector<1x1x8x16xf32> to vector<8x16xf32>
    %177 = vector.extract_strided_slice %176 {offsets = [0, 0], sizes = [8, 8], strides = [1, 1]} : vector<8x16xf32> to vector<8x8xf32>
    %cst_169 = arith.constant dense<0.000000e+00> : vector<8x256xf32>
    %178 = tpu.matmul %177, %174, %cst_169 {dimension_numbers = #tpu.dot_dimension_numbers<[1], [0], [0], [1], [0, 0, 1, 1], [], []>} : vector<8x8xf32>, vector<8x256xf32>, vector<8x256xf32> -> vector<8x256xf32>
    %c1_170 = arith.constant 1 : index
    %c0_171 = arith.constant 0 : index
    %c0_172 = arith.constant 0 : index
    %179 = vector.load %arg2[%c1_170, %c0_171, %c0_172] : memref<9x8x256xf32, #tpu.memory_space<vmem>>, vector<1x8x256xf32>
    %180 = vector.shape_cast %179 : vector<1x8x256xf32> to vector<8x256xf32>
    %181 = arith.mulf %178, %180 : vector<8x256xf32>
    %182 = arith.addf %173, %181 : vector<8x256xf32>
    %c15_i32_173 = arith.constant 15 : i32
    %183 = tpu.dynamic_rotate %156 by %c15_i32_173 dim 1 : vector<8x256xf32>, i32 -> vector<8x256xf32>
    %c2_174 = arith.constant 2 : index
    %c2_175 = arith.constant 2 : index
    %c0_176 = arith.constant 0 : index
    %c0_177 = arith.constant 0 : index
    %184 = vector.load %arg3[%c2_174, %c2_175, %c0_176, %c0_177] : memref<4x9x8x16xf32, #tpu.memory_space<vmem>>, vector<1x1x8x16xf32>
    %185 = vector.shape_cast %184 : vector<1x1x8x16xf32> to vector<8x16xf32>
    %186 = vector.extract_strided_slice %185 {offsets = [0, 0], sizes = [8, 8], strides = [1, 1]} : vector<8x16xf32> to vector<8x8xf32>
    %cst_178 = arith.constant dense<0.000000e+00> : vector<8x256xf32>
    %187 = tpu.matmul %186, %183, %cst_178 {dimension_numbers = #tpu.dot_dimension_numbers<[1], [0], [0], [1], [0, 0, 1, 1], [], []>} : vector<8x8xf32>, vector<8x256xf32>, vector<8x256xf32> -> vector<8x256xf32>
    %c2_179 = arith.constant 2 : index
    %c0_180 = arith.constant 0 : index
    %c0_181 = arith.constant 0 : index
    %188 = vector.load %arg2[%c2_179, %c0_180, %c0_181] : memref<9x8x256xf32, #tpu.memory_space<vmem>>, vector<1x8x256xf32>
    %189 = vector.shape_cast %188 : vector<1x8x256xf32> to vector<8x256xf32>
    %190 = arith.mulf %187, %189 : vector<8x256xf32>
    %191 = arith.addf %182, %190 : vector<8x256xf32>
    %c1_i32_182 = arith.constant 1 : i32
    %192 = tpu.dynamic_rotate %156 by %c1_i32_182 dim 1 : vector<8x256xf32>, i32 -> vector<8x256xf32>
    %c2_183 = arith.constant 2 : index
    %c3_184 = arith.constant 3 : index
    %c0_185 = arith.constant 0 : index
    %c0_186 = arith.constant 0 : index
    %193 = vector.load %arg3[%c2_183, %c3_184, %c0_185, %c0_186] : memref<4x9x8x16xf32, #tpu.memory_space<vmem>>, vector<1x1x8x16xf32>
    %194 = vector.shape_cast %193 : vector<1x1x8x16xf32> to vector<8x16xf32>
    %195 = vector.extract_strided_slice %194 {offsets = [0, 0], sizes = [8, 8], strides = [1, 1]} : vector<8x16xf32> to vector<8x8xf32>
    %cst_187 = arith.constant dense<0.000000e+00> : vector<8x256xf32>
    %196 = tpu.matmul %195, %192, %cst_187 {dimension_numbers = #tpu.dot_dimension_numbers<[1], [0], [0], [1], [0, 0, 1, 1], [], []>} : vector<8x8xf32>, vector<8x256xf32>, vector<8x256xf32> -> vector<8x256xf32>
    %c3_188 = arith.constant 3 : index
    %c0_189 = arith.constant 0 : index
    %c0_190 = arith.constant 0 : index
    %197 = vector.load %arg2[%c3_188, %c0_189, %c0_190] : memref<9x8x256xf32, #tpu.memory_space<vmem>>, vector<1x8x256xf32>
    %198 = vector.shape_cast %197 : vector<1x8x256xf32> to vector<8x256xf32>
    %199 = arith.mulf %196, %198 : vector<8x256xf32>
    %200 = arith.addf %191, %199 : vector<8x256xf32>
    %c255_i32_191 = arith.constant 255 : i32
    %201 = tpu.dynamic_rotate %156 by %c255_i32_191 dim 1 : vector<8x256xf32>, i32 -> vector<8x256xf32>
    %c2_192 = arith.constant 2 : index
    %c5_193 = arith.constant 5 : index
    %c0_194 = arith.constant 0 : index
    %c0_195 = arith.constant 0 : index
    %202 = vector.load %arg3[%c2_192, %c5_193, %c0_194, %c0_195] : memref<4x9x8x16xf32, #tpu.memory_space<vmem>>, vector<1x1x8x16xf32>
    %203 = vector.shape_cast %202 : vector<1x1x8x16xf32> to vector<8x16xf32>
    %204 = vector.extract_strided_slice %203 {offsets = [0, 0], sizes = [8, 8], strides = [1, 1]} : vector<8x16xf32> to vector<8x8xf32>
    %cst_196 = arith.constant dense<0.000000e+00> : vector<8x256xf32>
    %205 = tpu.matmul %204, %201, %cst_196 {dimension_numbers = #tpu.dot_dimension_numbers<[1], [0], [0], [1], [0, 0, 1, 1], [], []>} : vector<8x8xf32>, vector<8x256xf32>, vector<8x256xf32> -> vector<8x256xf32>
    %c5_197 = arith.constant 5 : index
    %c0_198 = arith.constant 0 : index
    %c0_199 = arith.constant 0 : index
    %206 = vector.load %arg2[%c5_197, %c0_198, %c0_199] : memref<9x8x256xf32, #tpu.memory_space<vmem>>, vector<1x8x256xf32>
    %207 = vector.shape_cast %206 : vector<1x8x256xf32> to vector<8x256xf32>
    %208 = arith.mulf %205, %207 : vector<8x256xf32>
    %209 = arith.addf %200, %208 : vector<8x256xf32>
    %c241_i32_200 = arith.constant 241 : i32
    %210 = tpu.dynamic_rotate %156 by %c241_i32_200 dim 1 : vector<8x256xf32>, i32 -> vector<8x256xf32>
    %c2_201 = arith.constant 2 : index
    %c6_202 = arith.constant 6 : index
    %c0_203 = arith.constant 0 : index
    %c0_204 = arith.constant 0 : index
    %211 = vector.load %arg3[%c2_201, %c6_202, %c0_203, %c0_204] : memref<4x9x8x16xf32, #tpu.memory_space<vmem>>, vector<1x1x8x16xf32>
    %212 = vector.shape_cast %211 : vector<1x1x8x16xf32> to vector<8x16xf32>
    %213 = vector.extract_strided_slice %212 {offsets = [0, 0], sizes = [8, 8], strides = [1, 1]} : vector<8x16xf32> to vector<8x8xf32>
    %cst_205 = arith.constant dense<0.000000e+00> : vector<8x256xf32>
    %214 = tpu.matmul %213, %210, %cst_205 {dimension_numbers = #tpu.dot_dimension_numbers<[1], [0], [0], [1], [0, 0, 1, 1], [], []>} : vector<8x8xf32>, vector<8x256xf32>, vector<8x256xf32> -> vector<8x256xf32>
    %c6_206 = arith.constant 6 : index
    %c0_207 = arith.constant 0 : index
    %c0_208 = arith.constant 0 : index
    %215 = vector.load %arg2[%c6_206, %c0_207, %c0_208] : memref<9x8x256xf32, #tpu.memory_space<vmem>>, vector<1x8x256xf32>
    %216 = vector.shape_cast %215 : vector<1x8x256xf32> to vector<8x256xf32>
    %217 = arith.mulf %214, %216 : vector<8x256xf32>
    %218 = arith.addf %209, %217 : vector<8x256xf32>
    %c240_i32_209 = arith.constant 240 : i32
    %219 = tpu.dynamic_rotate %156 by %c240_i32_209 dim 1 : vector<8x256xf32>, i32 -> vector<8x256xf32>
    %c2_210 = arith.constant 2 : index
    %c7_211 = arith.constant 7 : index
    %c0_212 = arith.constant 0 : index
    %c0_213 = arith.constant 0 : index
    %220 = vector.load %arg3[%c2_210, %c7_211, %c0_212, %c0_213] : memref<4x9x8x16xf32, #tpu.memory_space<vmem>>, vector<1x1x8x16xf32>
    %221 = vector.shape_cast %220 : vector<1x1x8x16xf32> to vector<8x16xf32>
    %222 = vector.extract_strided_slice %221 {offsets = [0, 0], sizes = [8, 8], strides = [1, 1]} : vector<8x16xf32> to vector<8x8xf32>
    %cst_214 = arith.constant dense<0.000000e+00> : vector<8x256xf32>
    %223 = tpu.matmul %222, %219, %cst_214 {dimension_numbers = #tpu.dot_dimension_numbers<[1], [0], [0], [1], [0, 0, 1, 1], [], []>} : vector<8x8xf32>, vector<8x256xf32>, vector<8x256xf32> -> vector<8x256xf32>
    %c7_215 = arith.constant 7 : index
    %c0_216 = arith.constant 0 : index
    %c0_217 = arith.constant 0 : index
    %224 = vector.load %arg2[%c7_215, %c0_216, %c0_217] : memref<9x8x256xf32, #tpu.memory_space<vmem>>, vector<1x8x256xf32>
    %225 = vector.shape_cast %224 : vector<1x8x256xf32> to vector<8x256xf32>
    %226 = arith.mulf %223, %225 : vector<8x256xf32>
    %227 = arith.addf %218, %226 : vector<8x256xf32>
    %c239_i32_218 = arith.constant 239 : i32
    %228 = tpu.dynamic_rotate %156 by %c239_i32_218 dim 1 : vector<8x256xf32>, i32 -> vector<8x256xf32>
    %c2_219 = arith.constant 2 : index
    %c8_220 = arith.constant 8 : index
    %c0_221 = arith.constant 0 : index
    %c0_222 = arith.constant 0 : index
    %229 = vector.load %arg3[%c2_219, %c8_220, %c0_221, %c0_222] : memref<4x9x8x16xf32, #tpu.memory_space<vmem>>, vector<1x1x8x16xf32>
    %230 = vector.shape_cast %229 : vector<1x1x8x16xf32> to vector<8x16xf32>
    %231 = vector.extract_strided_slice %230 {offsets = [0, 0], sizes = [8, 8], strides = [1, 1]} : vector<8x16xf32> to vector<8x8xf32>
    %cst_223 = arith.constant dense<0.000000e+00> : vector<8x256xf32>
    %232 = tpu.matmul %231, %228, %cst_223 {dimension_numbers = #tpu.dot_dimension_numbers<[1], [0], [0], [1], [0, 0, 1, 1], [], []>} : vector<8x8xf32>, vector<8x256xf32>, vector<8x256xf32> -> vector<8x256xf32>
    %c8_224 = arith.constant 8 : index
    %c0_225 = arith.constant 0 : index
    %c0_226 = arith.constant 0 : index
    %233 = vector.load %arg2[%c8_224, %c0_225, %c0_226] : memref<9x8x256xf32, #tpu.memory_space<vmem>>, vector<1x8x256xf32>
    %234 = vector.shape_cast %233 : vector<1x8x256xf32> to vector<8x256xf32>
    %235 = arith.mulf %232, %234 : vector<8x256xf32>
    %236 = arith.addf %227, %235 : vector<8x256xf32>
    %cst_227 = arith.constant 0.000000e+00 : f32
    %237 = vector.broadcast %cst_227 : f32 to vector<8x256xf32>
    %238 = arith.maximumf %236, %237 : vector<8x256xf32>
    %c3_228 = arith.constant 3 : index
    %c0_229 = arith.constant 0 : index
    %c0_230 = arith.constant 0 : index
    %239 = vector.load %arg4[%c3_228, %c0_229, %c0_230] : memref<4x8x1xf32, #tpu.memory_space<vmem>>, vector<1x8x1xf32>
    %240 = vector.shape_cast %239 : vector<1x8x1xf32> to vector<8x1xf32>
    %c3_231 = arith.constant 3 : index
    %c4_232 = arith.constant 4 : index
    %c0_233 = arith.constant 0 : index
    %c0_234 = arith.constant 0 : index
    %241 = vector.load %arg3[%c3_231, %c4_232, %c0_233, %c0_234] : memref<4x9x8x16xf32, #tpu.memory_space<vmem>>, vector<1x1x8x16xf32>
    %242 = vector.shape_cast %241 : vector<1x1x8x16xf32> to vector<8x16xf32>
    %243 = vector.extract_strided_slice %242 {offsets = [0, 0], sizes = [8, 8], strides = [1, 1]} : vector<8x16xf32> to vector<8x8xf32>
    %cst_235 = arith.constant dense<0.000000e+00> : vector<8x256xf32>
    %244 = tpu.matmul %243, %238, %cst_235 {dimension_numbers = #tpu.dot_dimension_numbers<[1], [0], [0], [1], [0, 0, 1, 1], [], []>} : vector<8x8xf32>, vector<8x256xf32>, vector<8x256xf32> -> vector<8x256xf32>
    %245 = vector.broadcast %240 : vector<8x1xf32> to vector<8x256xf32>
    %246 = arith.addf %244, %245 : vector<8x256xf32>
    %c17_i32_236 = arith.constant 17 : i32
    %247 = tpu.dynamic_rotate %238 by %c17_i32_236 dim 1 : vector<8x256xf32>, i32 -> vector<8x256xf32>
    %c3_237 = arith.constant 3 : index
    %c0_238 = arith.constant 0 : index
    %c0_239 = arith.constant 0 : index
    %c0_240 = arith.constant 0 : index
    %248 = vector.load %arg3[%c3_237, %c0_238, %c0_239, %c0_240] : memref<4x9x8x16xf32, #tpu.memory_space<vmem>>, vector<1x1x8x16xf32>
    %249 = vector.shape_cast %248 : vector<1x1x8x16xf32> to vector<8x16xf32>
    %250 = vector.extract_strided_slice %249 {offsets = [0, 0], sizes = [8, 8], strides = [1, 1]} : vector<8x16xf32> to vector<8x8xf32>
    %cst_241 = arith.constant dense<0.000000e+00> : vector<8x256xf32>
    %251 = tpu.matmul %250, %247, %cst_241 {dimension_numbers = #tpu.dot_dimension_numbers<[1], [0], [0], [1], [0, 0, 1, 1], [], []>} : vector<8x8xf32>, vector<8x256xf32>, vector<8x256xf32> -> vector<8x256xf32>
    %c0_242 = arith.constant 0 : index
    %c0_243 = arith.constant 0 : index
    %c0_244 = arith.constant 0 : index
    %252 = vector.load %arg2[%c0_242, %c0_243, %c0_244] : memref<9x8x256xf32, #tpu.memory_space<vmem>>, vector<1x8x256xf32>
    %253 = vector.shape_cast %252 : vector<1x8x256xf32> to vector<8x256xf32>
    %254 = arith.mulf %251, %253 : vector<8x256xf32>
    %255 = arith.addf %246, %254 : vector<8x256xf32>
    %c16_i32_245 = arith.constant 16 : i32
    %256 = tpu.dynamic_rotate %238 by %c16_i32_245 dim 1 : vector<8x256xf32>, i32 -> vector<8x256xf32>
    %c3_246 = arith.constant 3 : index
    %c1_247 = arith.constant 1 : index
    %c0_248 = arith.constant 0 : index
    %c0_249 = arith.constant 0 : index
    %257 = vector.load %arg3[%c3_246, %c1_247, %c0_248, %c0_249] : memref<4x9x8x16xf32, #tpu.memory_space<vmem>>, vector<1x1x8x16xf32>
    %258 = vector.shape_cast %257 : vector<1x1x8x16xf32> to vector<8x16xf32>
    %259 = vector.extract_strided_slice %258 {offsets = [0, 0], sizes = [8, 8], strides = [1, 1]} : vector<8x16xf32> to vector<8x8xf32>
    %cst_250 = arith.constant dense<0.000000e+00> : vector<8x256xf32>
    %260 = tpu.matmul %259, %256, %cst_250 {dimension_numbers = #tpu.dot_dimension_numbers<[1], [0], [0], [1], [0, 0, 1, 1], [], []>} : vector<8x8xf32>, vector<8x256xf32>, vector<8x256xf32> -> vector<8x256xf32>
    %c1_251 = arith.constant 1 : index
    %c0_252 = arith.constant 0 : index
    %c0_253 = arith.constant 0 : index
    %261 = vector.load %arg2[%c1_251, %c0_252, %c0_253] : memref<9x8x256xf32, #tpu.memory_space<vmem>>, vector<1x8x256xf32>
    %262 = vector.shape_cast %261 : vector<1x8x256xf32> to vector<8x256xf32>
    %263 = arith.mulf %260, %262 : vector<8x256xf32>
    %264 = arith.addf %255, %263 : vector<8x256xf32>
    %c15_i32_254 = arith.constant 15 : i32
    %265 = tpu.dynamic_rotate %238 by %c15_i32_254 dim 1 : vector<8x256xf32>, i32 -> vector<8x256xf32>
    %c3_255 = arith.constant 3 : index
    %c2_256 = arith.constant 2 : index
    %c0_257 = arith.constant 0 : index
    %c0_258 = arith.constant 0 : index
    %266 = vector.load %arg3[%c3_255, %c2_256, %c0_257, %c0_258] : memref<4x9x8x16xf32, #tpu.memory_space<vmem>>, vector<1x1x8x16xf32>
    %267 = vector.shape_cast %266 : vector<1x1x8x16xf32> to vector<8x16xf32>
    %268 = vector.extract_strided_slice %267 {offsets = [0, 0], sizes = [8, 8], strides = [1, 1]} : vector<8x16xf32> to vector<8x8xf32>
    %cst_259 = arith.constant dense<0.000000e+00> : vector<8x256xf32>
    %269 = tpu.matmul %268, %265, %cst_259 {dimension_numbers = #tpu.dot_dimension_numbers<[1], [0], [0], [1], [0, 0, 1, 1], [], []>} : vector<8x8xf32>, vector<8x256xf32>, vector<8x256xf32> -> vector<8x256xf32>
    %c2_260 = arith.constant 2 : index
    %c0_261 = arith.constant 0 : index
    %c0_262 = arith.constant 0 : index
    %270 = vector.load %arg2[%c2_260, %c0_261, %c0_262] : memref<9x8x256xf32, #tpu.memory_space<vmem>>, vector<1x8x256xf32>
    %271 = vector.shape_cast %270 : vector<1x8x256xf32> to vector<8x256xf32>
    %272 = arith.mulf %269, %271 : vector<8x256xf32>
    %273 = arith.addf %264, %272 : vector<8x256xf32>
    %c1_i32_263 = arith.constant 1 : i32
    %274 = tpu.dynamic_rotate %238 by %c1_i32_263 dim 1 : vector<8x256xf32>, i32 -> vector<8x256xf32>
    %c3_264 = arith.constant 3 : index
    %c3_265 = arith.constant 3 : index
    %c0_266 = arith.constant 0 : index
    %c0_267 = arith.constant 0 : index
    %275 = vector.load %arg3[%c3_264, %c3_265, %c0_266, %c0_267] : memref<4x9x8x16xf32, #tpu.memory_space<vmem>>, vector<1x1x8x16xf32>
    %276 = vector.shape_cast %275 : vector<1x1x8x16xf32> to vector<8x16xf32>
    %277 = vector.extract_strided_slice %276 {offsets = [0, 0], sizes = [8, 8], strides = [1, 1]} : vector<8x16xf32> to vector<8x8xf32>
    %cst_268 = arith.constant dense<0.000000e+00> : vector<8x256xf32>
    %278 = tpu.matmul %277, %274, %cst_268 {dimension_numbers = #tpu.dot_dimension_numbers<[1], [0], [0], [1], [0, 0, 1, 1], [], []>} : vector<8x8xf32>, vector<8x256xf32>, vector<8x256xf32> -> vector<8x256xf32>
    %c3_269 = arith.constant 3 : index
    %c0_270 = arith.constant 0 : index
    %c0_271 = arith.constant 0 : index
    %279 = vector.load %arg2[%c3_269, %c0_270, %c0_271] : memref<9x8x256xf32, #tpu.memory_space<vmem>>, vector<1x8x256xf32>
    %280 = vector.shape_cast %279 : vector<1x8x256xf32> to vector<8x256xf32>
    %281 = arith.mulf %278, %280 : vector<8x256xf32>
    %282 = arith.addf %273, %281 : vector<8x256xf32>
    %c255_i32_272 = arith.constant 255 : i32
    %283 = tpu.dynamic_rotate %238 by %c255_i32_272 dim 1 : vector<8x256xf32>, i32 -> vector<8x256xf32>
    %c3_273 = arith.constant 3 : index
    %c5_274 = arith.constant 5 : index
    %c0_275 = arith.constant 0 : index
    %c0_276 = arith.constant 0 : index
    %284 = vector.load %arg3[%c3_273, %c5_274, %c0_275, %c0_276] : memref<4x9x8x16xf32, #tpu.memory_space<vmem>>, vector<1x1x8x16xf32>
    %285 = vector.shape_cast %284 : vector<1x1x8x16xf32> to vector<8x16xf32>
    %286 = vector.extract_strided_slice %285 {offsets = [0, 0], sizes = [8, 8], strides = [1, 1]} : vector<8x16xf32> to vector<8x8xf32>
    %cst_277 = arith.constant dense<0.000000e+00> : vector<8x256xf32>
    %287 = tpu.matmul %286, %283, %cst_277 {dimension_numbers = #tpu.dot_dimension_numbers<[1], [0], [0], [1], [0, 0, 1, 1], [], []>} : vector<8x8xf32>, vector<8x256xf32>, vector<8x256xf32> -> vector<8x256xf32>
    %c5_278 = arith.constant 5 : index
    %c0_279 = arith.constant 0 : index
    %c0_280 = arith.constant 0 : index
    %288 = vector.load %arg2[%c5_278, %c0_279, %c0_280] : memref<9x8x256xf32, #tpu.memory_space<vmem>>, vector<1x8x256xf32>
    %289 = vector.shape_cast %288 : vector<1x8x256xf32> to vector<8x256xf32>
    %290 = arith.mulf %287, %289 : vector<8x256xf32>
    %291 = arith.addf %282, %290 : vector<8x256xf32>
    %c241_i32_281 = arith.constant 241 : i32
    %292 = tpu.dynamic_rotate %238 by %c241_i32_281 dim 1 : vector<8x256xf32>, i32 -> vector<8x256xf32>
    %c3_282 = arith.constant 3 : index
    %c6_283 = arith.constant 6 : index
    %c0_284 = arith.constant 0 : index
    %c0_285 = arith.constant 0 : index
    %293 = vector.load %arg3[%c3_282, %c6_283, %c0_284, %c0_285] : memref<4x9x8x16xf32, #tpu.memory_space<vmem>>, vector<1x1x8x16xf32>
    %294 = vector.shape_cast %293 : vector<1x1x8x16xf32> to vector<8x16xf32>
    %295 = vector.extract_strided_slice %294 {offsets = [0, 0], sizes = [8, 8], strides = [1, 1]} : vector<8x16xf32> to vector<8x8xf32>
    %cst_286 = arith.constant dense<0.000000e+00> : vector<8x256xf32>
    %296 = tpu.matmul %295, %292, %cst_286 {dimension_numbers = #tpu.dot_dimension_numbers<[1], [0], [0], [1], [0, 0, 1, 1], [], []>} : vector<8x8xf32>, vector<8x256xf32>, vector<8x256xf32> -> vector<8x256xf32>
    %c6_287 = arith.constant 6 : index
    %c0_288 = arith.constant 0 : index
    %c0_289 = arith.constant 0 : index
    %297 = vector.load %arg2[%c6_287, %c0_288, %c0_289] : memref<9x8x256xf32, #tpu.memory_space<vmem>>, vector<1x8x256xf32>
    %298 = vector.shape_cast %297 : vector<1x8x256xf32> to vector<8x256xf32>
    %299 = arith.mulf %296, %298 : vector<8x256xf32>
    %300 = arith.addf %291, %299 : vector<8x256xf32>
    %c240_i32_290 = arith.constant 240 : i32
    %301 = tpu.dynamic_rotate %238 by %c240_i32_290 dim 1 : vector<8x256xf32>, i32 -> vector<8x256xf32>
    %c3_291 = arith.constant 3 : index
    %c7_292 = arith.constant 7 : index
    %c0_293 = arith.constant 0 : index
    %c0_294 = arith.constant 0 : index
    %302 = vector.load %arg3[%c3_291, %c7_292, %c0_293, %c0_294] : memref<4x9x8x16xf32, #tpu.memory_space<vmem>>, vector<1x1x8x16xf32>
    %303 = vector.shape_cast %302 : vector<1x1x8x16xf32> to vector<8x16xf32>
    %304 = vector.extract_strided_slice %303 {offsets = [0, 0], sizes = [8, 8], strides = [1, 1]} : vector<8x16xf32> to vector<8x8xf32>
    %cst_295 = arith.constant dense<0.000000e+00> : vector<8x256xf32>
    %305 = tpu.matmul %304, %301, %cst_295 {dimension_numbers = #tpu.dot_dimension_numbers<[1], [0], [0], [1], [0, 0, 1, 1], [], []>} : vector<8x8xf32>, vector<8x256xf32>, vector<8x256xf32> -> vector<8x256xf32>
    %c7_296 = arith.constant 7 : index
    %c0_297 = arith.constant 0 : index
    %c0_298 = arith.constant 0 : index
    %306 = vector.load %arg2[%c7_296, %c0_297, %c0_298] : memref<9x8x256xf32, #tpu.memory_space<vmem>>, vector<1x8x256xf32>
    %307 = vector.shape_cast %306 : vector<1x8x256xf32> to vector<8x256xf32>
    %308 = arith.mulf %305, %307 : vector<8x256xf32>
    %309 = arith.addf %300, %308 : vector<8x256xf32>
    %c239_i32_299 = arith.constant 239 : i32
    %310 = tpu.dynamic_rotate %238 by %c239_i32_299 dim 1 : vector<8x256xf32>, i32 -> vector<8x256xf32>
    %c3_300 = arith.constant 3 : index
    %c8_301 = arith.constant 8 : index
    %c0_302 = arith.constant 0 : index
    %c0_303 = arith.constant 0 : index
    %311 = vector.load %arg3[%c3_300, %c8_301, %c0_302, %c0_303] : memref<4x9x8x16xf32, #tpu.memory_space<vmem>>, vector<1x1x8x16xf32>
    %312 = vector.shape_cast %311 : vector<1x1x8x16xf32> to vector<8x16xf32>
    %313 = vector.extract_strided_slice %312 {offsets = [0, 0], sizes = [8, 8], strides = [1, 1]} : vector<8x16xf32> to vector<8x8xf32>
    %cst_304 = arith.constant dense<0.000000e+00> : vector<8x256xf32>
    %314 = tpu.matmul %313, %310, %cst_304 {dimension_numbers = #tpu.dot_dimension_numbers<[1], [0], [0], [1], [0, 0, 1, 1], [], []>} : vector<8x8xf32>, vector<8x256xf32>, vector<8x256xf32> -> vector<8x256xf32>
    %c8_305 = arith.constant 8 : index
    %c0_306 = arith.constant 0 : index
    %c0_307 = arith.constant 0 : index
    %315 = vector.load %arg2[%c8_305, %c0_306, %c0_307] : memref<9x8x256xf32, #tpu.memory_space<vmem>>, vector<1x8x256xf32>
    %316 = vector.shape_cast %315 : vector<1x8x256xf32> to vector<8x256xf32>
    %317 = arith.mulf %314, %316 : vector<8x256xf32>
    %318 = arith.addf %309, %317 : vector<8x256xf32>
    %319 = arith.addf %318, %156 : vector<8x256xf32>
    %cst_308 = arith.constant 0.000000e+00 : f32
    %320 = vector.broadcast %cst_308 : f32 to vector<8x256xf32>
    %321 = arith.maximumf %319, %320 : vector<8x256xf32>
    %c0_309 = arith.constant 0 : index
    %c0_310 = arith.constant 0 : index
    %c0_311 = arith.constant 0 : index
    %322 = vector.load %arg5[%c0_309, %c0_310, %c0_311] : memref<1x8x256xf32, #tpu.memory_space<vmem>>, vector<1x8x256xf32>
    %323 = vector.shape_cast %322 : vector<1x8x256xf32> to vector<8x256xf32>
    %324 = vector.shape_cast %321 : vector<8x256xf32> to vector<1x8x256xf32>
    tpu.vector_store %arg5[%c0_309, %c0_310, %c0_311], %324 {strides = array<i32>} : memref<1x8x256xf32, #tpu.memory_space<vmem>>, vector<1x8x256xf32>,
    return
  }
  func.func @transform_0(%arg0: i32) -> (i32, i32, i32) {
    %c0_i32 = arith.constant 0 : i32
    %c0_i32_0 = arith.constant 0 : i32
    %c0_i32_1 = arith.constant 0 : i32
    return %arg0, %c0_i32, %c0_i32_0 : i32, i32, i32
  }
  func.func @transform_1(%arg0: i32) -> (i32, i32, i32) {
    %c0_i32 = arith.constant 0 : i32
    %c0_i32_0 = arith.constant 0 : i32
    %c0_i32_1 = arith.constant 0 : i32
    %c0_i32_2 = arith.constant 0 : i32
    return %c0_i32, %c0_i32_0, %c0_i32_1 : i32, i32, i32
  }
  func.func @transform_2(%arg0: i32) -> (i32, i32, i32, i32) {
    %c0_i32 = arith.constant 0 : i32
    %c0_i32_0 = arith.constant 0 : i32
    %c0_i32_1 = arith.constant 0 : i32
    %c0_i32_2 = arith.constant 0 : i32
    %c0_i32_3 = arith.constant 0 : i32
    return %c0_i32, %c0_i32_0, %c0_i32_1, %c0_i32_2 : i32, i32, i32, i32
  }
  func.func @transform_3(%arg0: i32) -> (i32, i32, i32) {
    %c0_i32 = arith.constant 0 : i32
    %c0_i32_0 = arith.constant 0 : i32
    %c0_i32_1 = arith.constant 0 : i32
    %c0_i32_2 = arith.constant 0 : i32
    return %c0_i32, %c0_i32_0, %c0_i32_1 : i32, i32, i32
  }
  func.func @transform_4(%arg0: i32) -> (i32, i32, i32) {
    %c0_i32 = arith.constant 0 : i32
    %c0_i32_0 = arith.constant 0 : i32
    %c0_i32_1 = arith.constant 0 : i32
    return %arg0, %c0_i32, %c0_i32_0 : i32, i32, i32
  }
}

</mosaic_0001>

<bundles_post_ra>
// kernel: tpu_custom_call.1
= control target key start
LH: loop header
LB: loop body
LE: loop exit
PB: predicated region body
PF: predicated region fallthrough
CT: control target
= control target key end

     0   :  { %9 = vsyncpa [#allocation3], 0  ;;  %s4666_s0 = inlined_call_operand.hbm [shape: f32[2,16,256], index: 0, kind: input, shape index: {}]   ;;  %s4667_s1 = inlined_call_operand.hbm [shape: f32[9,8,256], index: 1, kind: input, shape index: {}]   ;;  %s4668_s2 = inlined_call_operand.hbm [shape: f32[4,9,8,16], index: 2, kind: input, shape index: {}]   ;;  %s4669_s3 = inlined_call_operand.vmem [shape: f32[4,8,1], index: 3, kind: input, shape index: {}]   ;;  %s4670_s4 = inlined_call_operand.hbm [shape: f32[2,8,256], index: 4, kind: output, shape index: {}]  }
   0x1   :  { %11 = vsyncpa [#allocation3 + $0x1], 0 }
   0x2   :  { %12 = vsyncpa [#allocation6], 0 }
   0x3   :  { %13 = vsyncpa [#allocation4], 0 }
   0x4   :  { %15 = vsyncpa [#allocation4 + $0x1], 0  ;;  %s3989_s15 = smov 0   ;;  %s3991_s16 = smov 0  }
   0x5   :  { %s3993_s17 = smov 0   ;;  %s3995_s18 = smov 0  }
   0x6 LB: > { %s4010_s19 = sadd.s32 4294967295, %s3944_s18   ;;  %s3530_s20 = sadd.s32 4294967294, %s3944_s18   ;;  %s3944_s18 = sphi %s3995_s18, %s4690_s18   ;;  %s3940_s17 = sphi %s3993_s17, %s4689_s17   ;;  %s3936_s16 = sphi %s3991_s16, %s4688_s16   ;;  %s3932_s15 = sphi %s3989_s15, %s4687_s15  }
   0x7   : > { %p41_p0 = scmp.ne.s32.totalorder %s3936_s16, %s3932_s15  ;;  %p4671_p1 = scmp.eq.s32.totalorder %s4010_s19, 0 }
   0x8   : > { %p134_p3 = scmp.eq.s32.totalorder %s3530_s20, 1  ;;  %p3531_p5 = scmp.ge.s32.totalorder %s3944_s18, 1 }
   0x9   : > { %p4019_p4 = por %p4671_p1, %p41_p0  ;;  %p141_p7 = scmp.lt.s32.totalorder %s3944_s18, 3 }
   0xa   : > { %p4024_p6 = por %p134_p3, %p41_p0  ;;  %s3946_s24 = smov [#allocation5]  }
   0xb   : > { %s4674_s21 = scalar_select %p4019_p4, 1, 0 }
   0xc   : > { %s4675_s22 = scalar_select %p4024_p6, 1, 0 }
   0xd   : > { %p4029_p8 = pnand %p3531_p5, %p141_p7  ;;  %s153_s25 = sshll.u32 %s3946_s24, 4  ;;  %s4033_s25 = int_to_ptr.vmem [resolvable:$true] %s153_s25 }
   0xe   : > { %s3947_s27 = smov [#allocation7]   ;;  %s3788_s5 = scalar_lea.hbm %s4667_s1, 2304 }
   0xf   : > { %p3637_p9 = pneg %p4029_p8  ;;  %s166_s28 = sshll.u32 %s3947_s27, 4  ;;  %s4044_s28 = int_to_ptr.vmem [resolvable:$true] %s166_s28 }
  0x10   : > { %p3789_p12 = scmp.ne.s32.totalorder %s4667_s1, %s3788_s5  ;;  %p3795_p5 = scmp.lt.u32.totalorder %s3788_s5, %s4667_s1 }
  0x11   : > { %p4040_p11 = pnand %p3637_p9, %p4671_p1 }
  0x13   : > { %p3790_p13 = pneg %p4040_p11 }
  0x15   : > { %p3791_p0 = pnand %p3790_p13, %p3789_p12 }
  0x17   : > { %p3792_p3 = pneg %p3791_p0 }
  0x19   : > { %p3797_p7 = pnand %p3795_p5, %p3792_p3 }
  0x1b   : > { %3800 = shalt.err (!%p3797_p7)
}
  0x1c   : > { %s3801_s10 = scalar_lea.vmem %s4033_s25, 2304  ;;  %p3809_p2 = scmp.lt.s32.totalorder %s4033_s25, %s4033_s25 }
  0x1d   : > { %p3802_p9 = scmp.ne.s32.totalorder %s4033_s25, %s3801_s10  ;;  %p3810_p12 = scmp.lt.s32.totalorder %s3801_s10, %s3801_s10 }
  0x1f   : > { %p3804_p10 = pnand %p3802_p9, %p3790_p13  ;;  %p3811_p0 = por %p3810_p12, %p3809_p2 }
  0x21   : > { %p3805_p1 = pneg %p3804_p10 }
  0x23   : > { %p3812_p6 = pnand %p3811_p0, %p3805_p1 }
  0x25   : > { %3815 = shalt.err (!%p3812_p6)
}
  0x26   : > { %s3948_s11 = smov 256   ;;  %s3949_s12 = smov 16  }
  0x27   : > { %3640 = dma.hbm_to_vmem [thread:$0]  (!%p4040_p11), %s4667_s1, 2304, %s4033_s25, [#allocation6], %s3948_s11, %s3948_s11, %s3949_s12  }
  0x28   : > { %s3816_s27 = scalar_lea.hbm %s4668_s2, 4608 }
  0x29   : > { %p3817_p1 = scmp.ne.s32.totalorder %s4668_s2, %s3816_s27  ;;  %p3823_p10 = scmp.lt.u32.totalorder %s3816_s27, %s4668_s2 }
  0x2b   : > { %p3819_p2 = pnand %p3817_p1, %p3790_p13 }
  0x2d   : > { %p3820_p6 = pneg %p3819_p2 }
  0x2f   : > { %p3825_p3 = pnand %p3823_p10, %p3820_p6 }
  0x31   : > { %3828 = shalt.err (!%p3825_p3)
}
  0x32   : > { %s3829_s25 = scalar_lea.vmem %s4044_s28, 4608  ;;  %p3837_p12 = scmp.lt.s32.totalorder %s4044_s28, %s4044_s28 }
  0x33   : > { %p3830_p5 = scmp.ne.s32.totalorder %s4044_s28, %s3829_s25  ;;  %p3838_p0 = scmp.lt.s32.totalorder %s3829_s25, %s3829_s25 }
  0x35   : > { %p3832_p7 = pnand %p3830_p5, %p3790_p13  ;;  %p3839_p1 = por %p3838_p0, %p3837_p12 }
  0x37   : > { %p3833_p9 = pneg %p3832_p7 }
  0x39   : > { %p3840_p2 = pnand %p3839_p1, %p3833_p9 }
  0x3b   : > { %3843 = shalt.err (!%p3840_p2)
}
  0x3c   : > { %s3950_s7 = smov 128   ;;  %s3951_s8 = smov 8  }
  0x3d   : > { %3643 = dma.hbm_to_vmem [thread:$0]  (!%p4040_p11), %s4668_s2, 4608, %s4044_s28, [#allocation6], %s3950_s7, %s3950_s7, %s3951_s8  }
  0x3e   : > { %s4102_s13 = sadd.s32 1, %s3944_s18   ;;  %s28_s20 = sadd.s32 1, %s3940_s17 }
  0x3f   : > { %s25_s14 = ssub.s32 %s3944_s18, %s4102_s13  ;;  %p35_p6 = scmp.ne.s32.totalorder %s3940_s17, %s3936_s16 }
  0x40   : > { %p26_p13 = scmp.eq.s32.totalorder %s25_s14, 0  ;;  %p36_p10 = scmp.eq.s32.totalorder %s3944_s18, 0 }
  0x41   : > { %p4678_p5 = scmp.eq.s32.totalorder %s4010_s19, 1  ;;  %p3654_p9 = scmp.lt.s32.totalorder %s3944_s18, 2 }
  0x42   : > { %s4111_s24 = scalar_select %p26_p13, %s3940_s17, %s28_s20  }
  0x43   : > { %p37_p3 = por %p36_p10, %p35_p6  ;;  %p4115_p7 = por %p4678_p5, %p35_p6 }
  0x44   : > { %s183_s26 = sand.u32 1, %s3940_s17   ;;  %s3587_s28 = sshll.u32 %s3944_s18, 9 }
  0x45   : > { %s4679_s27 = scalar_select %p4115_p7, 1, 0 }
  0x46   : > { %s3535_s29 = sshll.u32 %s183_s26, 5  ;;  %s4125_s6 = scalar_lea.hbm %s4666_s0, %s3587_s28 }
  0x47   : > { %s187_s25 = scalar_lea.vmem [#allocation2], %s3535_s29  ;;  %p4129_p11 = pnand %p3654_p9, %p37_p3 }
  0x48   : > { %s194_s7 = sshll.u32 %s187_s25, 4  ;;  %s4133_s9 = scalar_lea.sflag [#allocation3], %s183_s26  ;;  %s4127_s7 = int_to_ptr.vmem [resolvable:$true] %s194_s7 }
  0x49   : > { %s3844_s10 = scalar_lea.hbm %s4125_s6, 512  ;;  %p3846_p0 = pneg %p4129_p11 }
  0x4a   : > { %p3845_p12 = scmp.ne.s32.totalorder %s4125_s6, %s3844_s10  ;;  %s3849_s29 = scalar_lea.hbm %s4666_s0, 1024 }
  0x4b   : > { %p3850_p13 = scmp.lt.u32.totalorder %s4125_s6, %s4666_s0  ;;  %p3851_p6 = scmp.lt.u32.totalorder %s3849_s29, %s3844_s10 }
  0x4c   : > { %p3847_p1 = pnand %p3846_p0, %p3845_p12  ;;  %p3853_p3 = scmp.lt.u32.totalorder %s3844_s10, %s4125_s6 }
  0x4d   : > { %p3852_p10 = por %p3851_p6, %p3850_p13 }
  0x4e   : > { %p3848_p2 = pneg %p3847_p1 }
  0x4f   : > { %p3854_p5 = por %p3853_p3, %p3852_p10 }
  0x51   : > { %p3855_p9 = pnand %p3854_p5, %p3848_p2 }
  0x53   : > { %3858 = shalt.err (!%p3855_p9)
}
  0x54   : > { %s3859_s26 = scalar_lea.vmem %s4127_s7, 512  ;;  %s3952_s5 = smov [#allocation2]  }
  0x55   : > { %p3860_p12 = scmp.ne.s32.totalorder %s4127_s7, %s3859_s26  ;;  %s3864_s25 = sshll.u32 %s3952_s5, 4  ;;  %s3865_s25 = int_to_ptr.vmem [resolvable:$false] %s3864_s25 }
  0x56   : > { %s3866_s14 = scalar_lea.vmem %s3865_s25, 1024  ;;  %p3867_p4 = scmp.lt.s32.totalorder %s4127_s7, %s3865_s25 }
  0x57   : > { %p3862_p1 = pnand %p3860_p12, %p3846_p0  ;;  %p3868_p13 = scmp.lt.s32.totalorder %s3866_s14, %s3859_s26 }
  0x59   : > { %p3863_p7 = pneg %p3862_p1  ;;  %p3869_p6 = por %p3868_p13, %p3867_p4 }
  0x5b   : > { %p3870_p10 = pnand %p3869_p6, %p3863_p7 }
  0x5d   : > { %3873 = shalt.err (!%p3870_p10)
}
  0x5e   : > { %3647 = dma.hbm_to_vmem [thread:$0]  (!%p4129_p11), %s4125_s6, 512, %s4127_s7, %s4133_s9, %s3948_s11, %s3948_s11, %s3949_s12  }
  0x5f   : > { %206 = sbr.rel (%p4029_p8) target bundleno = 1594 (0x63a), region = 36  ;;  %s4167_s10 = sand.u32 (!%p4029_p8), 1, %s3936_s16  }
  0x60   : > { %s3539_s20 = sshll.u32 (!%p4029_p8), %s4167_s10, 5  ;;  %s209_s29 = scalar_lea.sflag (!%p4029_p8), [#allocation3], %s4167_s10 }
  0x61   : > { %s212_s28 = scalar_lea.vmem (!%p4029_p8), [#allocation2], %s3539_s20  ;;  %p4681_p4 = scmp.ne.s32.totalorder (!%p4029_p8), %s4674_s21, 0 }
  0x66   : > { %3919 = dma.done.wait (%p4681_p4), %s209_s29, 512  }
  0x67   : > { %3921 = vsyncadd (%p4681_p4), %s209_s29, 4294966784  ;;  %p4682_p7 = scmp.eq.s32.totalorder %s4010_s19, 0 }
  0x69   : > { %3923 = dma.done.wait (%p4682_p7), [#allocation6], 6912   ;;  %p4683_p11 = pmov %p4682_p7 }
  0x6a   : > { %v3953_v0 = vmov 0.0   ;;  %v245_v1 = vld [vmem:[%s212_s28] sm:$0xff]  ;;  %v247_v2 = vld [vmem:[%s212_s28 + $0x10] sm:$0xff]  ;;  %v246_v3 = vld [vmem:[%s212_s28 + $0x8] sm:$0xff]  ;;  %s3954_s23 = smov 16   ;;  %s3955_s21 = smov 17   ;;  %v340_v12 = vlaneseq }
  0x6b   : > { %3925 = vsyncadd (%p4683_p11), [#allocation6], 4294960384  ;;  %325 = vmatprep.mubr.f32.mxu0 %v3953_v0  ;;  %415 = vmatprep.mubr.f32.mxu1 %v3953_v0  ;;  %v3716_v4 = vpack.i.bf16 %v247_v2, %v245_v1  ;;  %v248_v5 = vld [vmem:[%s212_s28 + $0x18] sm:$0xff]  ;;  %v3591_v8 = vpack.c.bf16 %v247_v2, %v245_v1  ;;  %v251_v9 = vld [vmem:[#allocation7 + $0x20] sm:$0xff]  ;;  %vm257_vm0 = vcmask 130048   ;;  %s3956_s11 = smov 15  }
  0x6c   : > { %v3721_v6 = vpack.i.bf16 %v248_v5, %v246_v3  ;;  %v3589_v7 = vpack.c.bf16 %v248_v5, %v246_v3  ;;  %s3957_s12 = smov 1   ;;  %s3958_s6 = smov 127   ;;  %v3961_v10 = vmov 0   ;;  %v249_v11 = vld [vmem:[%s4669_s3] sm:$0xff]  ;;  %v4202_v13 = vand.u32 127, %v340_v12  ;;  %v347_v55 = vld [vmem:[#allocation7] sm:$0xff] }
  0x6d   : > { %3717 = vrot.lane.b32.xlu1 %v3716_v4, %s3954_s23  ;;  %3707 = vrot.lane.b32.xlu0 %v3716_v4, %s3955_s21  ;;  %s3959_s7 = smov 113   ;;  %s3960_s8 = smov 112   ;;  %v442_v57 = vld [vmem:[#allocation7 + $0x8] sm:$0xff]  ;;  %v634_v12 = vld [vmem:[#allocation7 + $0x18] sm:$0xff]  ;;  %vm1111_vm9 = vcmask 64512  }
  0x6e   : > { %3590 = vmatprep.subr.bf16.mxu0 %v3589_v7  ;;  %3786 = vset.pattern.permute.xlu0 %v3961_v10  ;;  %s3962_s9 = smov 111   ;;  %vm436_vm1 = vcmp.lt.s32.totalorder %v4202_v13, 16  ;;  %vm342_vm2 = vcmp.lt.s32.totalorder %v4202_v13, 17  ;;  %vm532_vm3 = vcmp.lt.s32.totalorder %v4202_v13, 15  ;;  %vm628_vm4 = vcmp.lt.s32.totalorder %v4202_v13, 1  ;;  %v538_v7 = vld [vmem:[#allocation7 + $0x10] sm:$0xff] }
  0x6f   : > { %3592 = vmatpush1.bf16.msra.mxu0 %v3591_v8  ;;  %3787 = vset.pattern.permute.xlu1 %v3961_v10  ;;  %vm724_vm5 = vcmp.lt.s32.totalorder %v4202_v13, 127  ;;  %vm820_vm6 = vcmp.lt.s32.totalorder %v4202_v13, 113  ;;  %vm916_vm7 = vcmp.lt.s32.totalorder %v4202_v13, 112  ;;  %vm1012_vm8 = vcmp.lt.s32.totalorder %v4202_v13, 111  ;;  %p4684_p0 = scmp.ne.s32.totalorder %s4679_s27, 0  ;;  %s3963_s30 = smov [#allocation8]  }
  0x70   : > { %s3878_s26 = sshll.u32 %s3963_s30, 4  ;;  %s3879_s26 = int_to_ptr.vmem [resolvable:$false] %s3878_s26 }
  0x71   : > { %3722 = vrot.lane.b32.xlu1 %v3721_v6, %s3954_s23  ;;  %3712 = vrot.lane.b32.xlu0 %v3721_v6, %s3955_s21  ;;  %s3880_s5 = scalar_lea.vmem %s3879_s26, 512 }
  0x72   : > { %3543 = vmatmul.mubr.msk.f32.vlgmr.msra.gmra.mrb[0].mxu0 %vm257_vm0, %v251_v9 }
  0x73   : > { %510 = vmatprep.mubr.f32.mxu0 %v3953_v0 }
  0x75   : > { %3732 = vrot.lane.b32.xlu1 %v3721_v6, %s3956_s11  ;;  %3727 = vrot.lane.b32.xlu0 %v3716_v4, %s3956_s11 }
  0x79   : > { %3742 = vrot.lane.b32.xlu1 %v3721_v6, %s3957_s12  ;;  %3737 = vrot.lane.b32.xlu0 %v3716_v4, %s3957_s12 }
  0x7d   : > { %3752 = vrot.lane.b32.xlu1 %v3721_v6, %s3958_s6  ;;  %3747 = vrot.lane.b32.xlu0 %v3716_v4, %s3958_s6 }
  0x81   : > { %3762 = vrot.lane.b32.xlu1 %v3721_v6, %s3959_s7  ;;  %3757 = vrot.lane.b32.xlu0 %v3716_v4, %s3959_s7 }
  0x85   : > { %3772 = vrot.lane.b32.xlu1 %v3721_v6, %s3960_s8  ;;  %3767 = vrot.lane.b32.xlu0 %v3716_v4, %s3960_s8 }
  0x89   : > { %3782 = vrot.lane.b32.xlu1 %v3721_v6, %s3962_s9  ;;  %3777 = vrot.lane.b32.xlu0 %v3716_v4, %s3962_s9 }
  0x8d   : > { %254 = vperm.xlu0 %3786, %v249_v11  }
  0xdf   : > { %v3718_v14 = vpop.permute.xlu1 %3717  ;;  %v3708_v15 = vpop.permute.xlu0 %3707 }
  0xe0   : > { %v3720_v16 = vunpack.i.h.bf16 %v3718_v14  ;;  %v3719_v17 = vunpack.i.l.bf16 %v3718_v14  ;;  %v3710_v18 = vunpack.i.h.bf16 %v3708_v15  ;;  %v3709_v19 = vunpack.i.l.bf16 %v3708_v15 }
  0xe3   : > { %v3723_v20 = vpop.permute.xlu1 %3722  ;;  %v3713_v21 = vpop.permute.xlu0 %3712 }
  0xe4   : > { %v3725_v22 = vunpack.i.h.bf16 %v3723_v20  ;;  %v3724_v23 = vunpack.i.l.bf16 %v3723_v20  ;;  %v3715_v24 = vunpack.i.h.bf16 %v3713_v21  ;;  %v3714_v25 = vunpack.i.l.bf16 %v3713_v21 }
  0xe6   : > { %v439_v26 = vsel %vm436_vm1, %v3724_v23, %v3719_v17  ;;  %v440_v27 = vsel %vm436_vm1, %v3725_v22, %v3720_v16  ;;  %v343_v28 = vsel %vm342_vm2, %v3709_v19, %v3714_v25  ;;  %v344_v29 = vsel %vm342_vm2, %v3710_v18, %v3715_v24 }
  0xe7   : > { %v3599_v30 = vpack.c.bf16 %v440_v27, %v439_v26  ;;  %v3733_v31 = vpop.permute.xlu1 %3732  ;;  %v3728_v32 = vpop.permute.xlu0 %3727  ;;  %v3593_v33 = vpack.c.bf16 %v344_v29, %v343_v28  ;;  %v437_v34 = vsel %vm436_vm1, %v3719_v17, %v3724_v23  ;;  %v438_v35 = vsel %vm436_vm1, %v3720_v16, %v3725_v22  ;;  %v730_v26 = vld [vmem:[#allocation7 + $0x28] sm:$0xff] }
  0xe8   : > { %v3735_v36 = vunpack.i.h.bf16 %v3733_v31  ;;  %v3734_v37 = vunpack.i.l.bf16 %v3733_v31  ;;  %v3730_v38 = vunpack.i.h.bf16 %v3728_v32  ;;  %v3729_v39 = vunpack.i.l.bf16 %v3728_v32 }
  0xe9   : > { %3594 = vmatprep.subr.bf16.mxu1 %v3593_v33  ;;  %v3597_v40 = vpack.c.bf16 %v438_v35, %v437_v34  ;;  %v345_v41 = vsel %vm342_vm2, %v3714_v25, %v3709_v19  ;;  %v346_v42 = vsel %vm342_vm2, %v3715_v24, %v3710_v18 }
  0xea   : > { %v536_v43 = vsel %vm532_vm3, %v3735_v36, %v3730_v38  ;;  %v535_v44 = vsel %vm532_vm3, %v3734_v37, %v3729_v39  ;;  %v3595_v45 = vpack.c.bf16 %v346_v42, %v345_v41  ;;  %v533_v46 = vsel %vm532_vm3, %v3729_v39, %v3734_v37  ;;  %v826_v39 = vld [vmem:[#allocation7 + $0x30] sm:$0xff] }
  0xeb   : > { %v3603_v47 = vpack.c.bf16 %v536_v43, %v535_v44  ;;  %3598 = vmatprep.subr.bf16.mxu0 %v3597_v40  ;;  %v3743_v48 = vpop.permute.xlu1 %3742  ;;  %v3738_v49 = vpop.permute.xlu0 %3737  ;;  %v534_v50 = vsel %vm532_vm3, %v3730_v38, %v3735_v36 }
  0xec   : > { %3596 = vmatpush1.bf16.msra.mxu1 %v3595_v45  ;;  %3600 = vmatpush1.bf16.msra.mxu0 %v3599_v30  ;;  %v3745_v51 = vunpack.i.h.bf16 %v3743_v48  ;;  %v3744_v52 = vunpack.i.l.bf16 %v3743_v48  ;;  %v3740_v53 = vunpack.i.h.bf16 %v3738_v49  ;;  %v3739_v54 = vunpack.i.l.bf16 %v3738_v49 }
  0xed   : > { %v3601_v56 = vpack.c.bf16 %v534_v50, %v533_v46  ;;  %v922_v50 = vld [vmem:[#allocation7 + $0x38] sm:$0xff] }
  0xee   : > { %v632_v58 = vsel %vm628_vm4, %v3745_v51, %v3740_v53  ;;  %v631_v59 = vsel %vm628_vm4, %v3744_v52, %v3739_v54  ;;  %v629_v60 = vsel %vm628_vm4, %v3739_v54, %v3744_v52  ;;  %v630_v61 = vsel %vm628_vm4, %v3740_v53, %v3745_v51 }
  0xef   : > { %v3607_v62 = vpack.c.bf16 %v632_v58, %v631_v59  ;;  %3602 = vmatprep.subr.bf16.mxu1 %v3601_v56  ;;  %3544 = vmatmul.mubr.msk.f32.vlgmr.msra.gmra.mrb[0].mxu1 %vm257_vm0, %v347_v55  ;;  %v3753_v63 = vpop.permute.xlu1 %3752  ;;  %v3748_v1 = vpop.permute.xlu0 %3747  ;;  %v3605_v2 = vpack.c.bf16 %v630_v61, %v629_v60  ;;  %v1018_v55 = vld [vmem:[#allocation7 + $0x40] sm:$0xff]  ;;  %v4292_v59 = vld [vmem:[#allocation5] sm:$0xff]  ;;  %v4294_v61 = vld [vmem:[#allocation5 + $0x8] sm:$0xff] }
  0xf0   : > { %3604 = vmatpush1.bf16.msra.mxu1 %v3603_v47  ;;  %v3755_v3 = vunpack.i.h.bf16 %v3753_v63  ;;  %v3754_v4 = vunpack.i.l.bf16 %v3753_v63  ;;  %v3750_v5 = vunpack.i.h.bf16 %v3748_v1  ;;  %v3749_v6 = vunpack.i.l.bf16 %v3748_v1  ;;  %3545 = vmatmul.mubr.msk.f32.vlgmr.msra.gmra.mrb[2].mxu0 %vm257_vm0, %v442_v57 }
  0xf1   : > { %3606 = vmatprep.subr.bf16.mxu0 %v3605_v2  ;;  %606 = vmatprep.mubr.f32.mxu1 %v3953_v0  ;;  %v4298_v2 = vld [vmem:[#allocation5 + $0x18] sm:$0xff] }
  0xf2   : > { %v726_v8 = vsel %vm724_vm5, %v3750_v5, %v3755_v3  ;;  %v725_v9 = vsel %vm724_vm5, %v3749_v6, %v3754_v4  ;;  %3608 = vmatpush1.bf16.msra.mxu0 %v3607_v62  ;;  %v727_v10 = vsel %vm724_vm5, %v3754_v4, %v3749_v6  ;;  %v728_v11 = vsel %vm724_vm5, %v3755_v3, %v3750_v5  ;;  %v4296_v62 = vld [vmem:[#allocation5 + $0x10] sm:$0xff] }
  0xf3   : > { %v3611_v14 = vpack.c.bf16 %v726_v8, %v725_v9  ;;  %v3763_v15 = vpop.permute.xlu1 %3762  ;;  %v3758_v16 = vpop.permute.xlu0 %3757  ;;  %v3609_v17 = vpack.c.bf16 %v728_v11, %v727_v10  ;;  %3546 = vmatmul.mubr.msk.f32.vlgmr.msra.gmra.mrb[2].mxu1 %vm257_vm0, %v538_v7  ;;  %702 = vmatprep.mubr.f32.mxu0 %v3953_v0  ;;  %v4303_v9 = vld [vmem:[#allocation5 + $0x20] sm:$0xff] }
  0xf4   : > { %v3765_v18 = vunpack.i.h.bf16 %v3763_v15  ;;  %v3764_v19 = vunpack.i.l.bf16 %v3763_v15  ;;  %v3760_v20 = vunpack.i.h.bf16 %v3758_v16  ;;  %v3759_v21 = vunpack.i.l.bf16 %v3758_v16  ;;  %798 = vmatprep.mubr.f32.mxu1 %v3953_v0  ;;  %v4308_v16 = vld [vmem:[#allocation5 + $0x30] sm:$0xff] }
  0xf5   : > { %3610 = vmatprep.subr.bf16.mxu1 %v3609_v17  ;;  %3547 = vmatmul.mubr.msk.f32.vlgmr.msra.gmra.mrb[4].mxu0 %vm257_vm0, %v634_v12  ;;  %v4306_v12 = vld [vmem:[#allocation5 + $0x28] sm:$0xff] }
  0xf6   : > { %v822_v22 = vsel %vm820_vm6, %v3760_v20, %v3765_v18  ;;  %v821_v23 = vsel %vm820_vm6, %v3759_v21, %v3764_v19  ;;  %3612 = vmatpush1.bf16.msra.mxu1 %v3611_v14  ;;  %v823_v24 = vsel %vm820_vm6, %v3764_v19, %v3759_v21  ;;  %v824_v25 = vsel %vm820_vm6, %v3765_v18, %v3760_v20  ;;  %v4311_v20 = vld [vmem:[#allocation5 + $0x38] sm:$0xff] }
  0xf7   : > { %v3615_v27 = vpack.c.bf16 %v822_v22, %v821_v23  ;;  %v3773_v28 = vpop.permute.xlu1 %3772  ;;  %v3768_v29 = vpop.permute.xlu0 %3767  ;;  %v3613_v30 = vpack.c.bf16 %v824_v25, %v823_v24  ;;  %894 = vmatprep.mubr.f32.mxu0 %v3953_v0 }
  0xf8   : > { %v3775_v31 = vunpack.i.h.bf16 %v3773_v28  ;;  %v3774_v32 = vunpack.i.l.bf16 %v3773_v28  ;;  %v3770_v33 = vunpack.i.h.bf16 %v3768_v29  ;;  %v3769_v34 = vunpack.i.l.bf16 %v3768_v29  ;;  %v4316_v29 = vld [vmem:[#allocation5 + $0x50] sm:$0xff] }
  0xf9   : > { %3614 = vmatprep.subr.bf16.mxu0 %v3613_v30  ;;  %3548 = vmatmul.mubr.msk.f32.vlgmr.msra.gmra.mrb[4].mxu1 %vm257_vm0, %v730_v26 }
  0xfa   : > { %v918_v35 = vsel %vm916_vm7, %v3770_v33, %v3775_v31  ;;  %v917_v36 = vsel %vm916_vm7, %v3769_v34, %v3774_v32  ;;  %3616 = vmatpush1.bf16.msra.mxu0 %v3615_v27  ;;  %v919_v37 = vsel %vm916_vm7, %v3774_v32, %v3769_v34  ;;  %v920_v38 = vsel %vm916_vm7, %v3775_v31, %v3770_v33  ;;  %v4318_v31 = vld [vmem:[#allocation5 + $0x58] sm:$0xff] }
  0xfb   : > { %v3619_v40 = vpack.c.bf16 %v918_v35, %v917_v36  ;;  %v3783_v41 = vpop.permute.xlu1 %3782  ;;  %v3778_v42 = vpop.permute.xlu0 %3777  ;;  %v3617_v43 = vpack.c.bf16 %v920_v38, %v919_v37  ;;  %990 = vmatprep.mubr.f32.mxu1 %v3953_v0  ;;  %v4322_v37 = vld [vmem:[#allocation5 + $0x60] sm:$0xff] }
  0xfc   : > { %v3785_v44 = vunpack.i.h.bf16 %v3783_v41  ;;  %v3784_v45 = vunpack.i.l.bf16 %v3783_v41  ;;  %v3780_v46 = vunpack.i.h.bf16 %v3778_v42  ;;  %v3779_v47 = vunpack.i.l.bf16 %v3778_v42 }
  0xfd   : > { %3618 = vmatprep.subr.bf16.mxu1 %v3617_v43  ;;  %3549 = vmatmul.mubr.msk.f32.vlgmr.msra.gmra.mrb[6].mxu0 %vm257_vm0, %v826_v39  ;;  %v4324_v39 = vld [vmem:[#allocation5 + $0x68] sm:$0xff] }
  0xfe   : > { %v1014_v48 = vsel %vm1012_vm8, %v3780_v46, %v3785_v44  ;;  %v1013_v49 = vsel %vm1012_vm8, %v3779_v47, %v3784_v45  ;;  %3620 = vmatpush1.bf16.msra.mxu1 %v3619_v40  ;;  %v1015_v51 = vsel %vm1012_vm8, %v3784_v45, %v3779_v47  ;;  %v1016_v52 = vsel %vm1012_vm8, %v3785_v44, %v3780_v46  ;;  %v4328_v45 = vld [vmem:[#allocation5 + $0x70] sm:$0xff]  ;;  %v4330_v47 = vld [vmem:[#allocation5 + $0x78] sm:$0xff] }
  0xff   : > { %v3623_v53 = vpack.c.bf16 %v1014_v48, %v1013_v49  ;;  %v3621_v54 = vpack.c.bf16 %v1016_v52, %v1015_v51  ;;  %1086 = vmatprep.mubr.f32.mxu0 %v3953_v0 }
 0x101   : > { %3550 = vmatmul.mubr.msk.f32.vlgmr.msra.gmra.mrb[6].mxu1 %vm257_vm0, %v922_v50  ;;  %3622 = vmatprep.subr.bf16.mxu0 %v3621_v54 }
 0x102   : > { %3624 = vmatpush1.bf16.msra.mxu0 %v3623_v53  ;;  %1179 = vmatprep.mubr.f32.mxu1 %v3953_v0  ;;  %v4334_v53 = vld [vmem:[#allocation5 + $0x80] sm:$0xff] }
 0x105   : > { %3551 = vmatmul.mubr.msk.f32.vlgmr.msra.gmra.mrb[8].mxu0 %vm257_vm0, %v1018_v55  ;;  %v4336_v55 = vld [vmem:[#allocation5 + $0x88] sm:$0xff] }
 0x106   : > { %1261 = vmatprep.mubr.f32.mxu0 %v3953_v0 }
 0x10c   : > { %v255_v58 = vpop.permute.xlu0 %254 }
 0x145   : > { %v327_v56 = vpop.f32.mrb[0].mxu0 }
 0x146   : > { %v329_v57 = vpop.f32.mrb[1].mxu0  ;;  %v328_v60 = vadd.f32 %v327_v56, %v255_v58 }
 0x147   : > { %v330_v1 = vadd.f32 %v329_v57, %v255_v58 }
 0x1c2   : > { %v417_v63 = vpop.f32.mrb[0].mxu1 }
 0x1c3   : > { %v424_v3 = vmul.f32 %v4292_v59, %v417_v63  ;;  %v419_v4 = vpop.f32.mrb[1].mxu1  ;;  %v512_v5 = vpop.f32.mrb[2].mxu0 }
 0x1c4   : > { %v425_v6 = vmul.f32 %v4294_v61, %v419_v4  ;;  %v520_v7 = vmul.f32 %v4296_v62, %v512_v5  ;;  %v514_v8 = vpop.f32.mrb[3].mxu0 }
 0x1c5   : > { %v426_v10 = vadd.f32 %v424_v3, %v328_v60  ;;  %v521_v11 = vmul.f32 %v4298_v2, %v514_v8 }
 0x1c6   : > { %v427_v14 = vadd.f32 %v425_v6, %v330_v1  ;;  %v608_v15 = vpop.f32.mrb[2].mxu1  ;;  %v1105_v6 = vld [vmem:[#allocation7 + $0x68] sm:$0xff] }
 0x1c7   : > { %v522_v17 = vadd.f32 %v520_v7, %v426_v10  ;;  %v616_v18 = vmul.f32 %v4303_v9, %v608_v15  ;;  %v610_v19 = vpop.f32.mrb[3].mxu1  ;;  %v3552_v7 = vld [vmem:[%s4669_s3 + $0x8] sm:$0xff] }
 0x1c8   : > { %v523_v21 = vadd.f32 %v521_v11, %v427_v14  ;;  %v617_v22 = vmul.f32 %v4306_v12, %v610_v19  ;;  %v704_v23 = vpop.f32.mrb[4].mxu0 }
 0x1c9   : > { %v618_v24 = vadd.f32 %v616_v18, %v522_v17  ;;  %v712_v25 = vmul.f32 %v4308_v16, %v704_v23  ;;  %v706_v26 = vpop.f32.mrb[5].mxu0  ;;  %v1193_v18 = vld [vmem:[#allocation7 + $0x48] sm:$0xff] }
 0x1ca   : > { %v619_v27 = vadd.f32 %v617_v22, %v523_v21  ;;  %v713_v28 = vmul.f32 %v4311_v20, %v706_v26 }
 0x1cb   : > { %v714_v30 = vadd.f32 %v712_v25, %v618_v24  ;;  %v1279_v24 = vld [vmem:[#allocation7 + $0x50] sm:$0xff] }
 0x1cc   : > { %v715_v32 = vadd.f32 %v713_v28, %v619_v27  ;;  %v800_v33 = vpop.f32.mrb[4].mxu1  ;;  %v1365_v28 = vld [vmem:[#allocation7 + $0x58] sm:$0xff] }
 0x1cd   : > { %v808_v34 = vmul.f32 %v4316_v29, %v800_v33  ;;  %v802_v35 = vpop.f32.mrb[5].mxu1 }
 0x1ce   : > { %v809_v36 = vmul.f32 %v4318_v31, %v802_v35  ;;  %v1451_v35 = vld [vmem:[#allocation7 + $0x60] sm:$0xff] }
 0x1cf   : > { %v810_v38 = vadd.f32 %v808_v34, %v714_v30 }
 0x1d0   : > { %v811_v40 = vadd.f32 %v809_v36, %v715_v32  ;;  %v896_v41 = vpop.f32.mrb[6].mxu0 }
 0x1d1   : > { %v904_v42 = vmul.f32 %v4322_v37, %v896_v41  ;;  %v898_v43 = vpop.f32.mrb[7].mxu0 }
 0x1d2   : > { %v905_v44 = vmul.f32 %v4324_v39, %v898_v43 }
 0x1d3   : > { %v906_v46 = vadd.f32 %v904_v42, %v810_v38  ;;  %v1537_v42 = vld [vmem:[#allocation7 + $0x70] sm:$0xff] }
 0x1d4   : > { %v907_v48 = vadd.f32 %v905_v44, %v811_v40  ;;  %v992_v49 = vpop.f32.mrb[6].mxu1 }
 0x1d5   : > { %v1000_v50 = vmul.f32 %v4328_v45, %v992_v49  ;;  %v994_v51 = vpop.f32.mrb[7].mxu1 }
 0x1d6   : > { %v1001_v52 = vmul.f32 %v4330_v47, %v994_v51 }
 0x1d7   : > { %v1002_v54 = vadd.f32 %v1000_v50, %v906_v46 }
 0x1d8   : > { %v1003_v56 = vadd.f32 %v1001_v52, %v907_v48  ;;  %v1088_v57 = vpop.f32.mrb[8].mxu0  ;;  %v1623_v48 = vld [vmem:[#allocation7 + $0x78] sm:$0xff] }
 0x1d9   : > { %v1096_v58 = vmul.f32 %v4334_v53, %v1088_v57  ;;  %v1090_v60 = vpop.f32.mrb[9].mxu0 }
 0x1da   : > { %v1097_v63 = vmul.f32 %v4336_v55, %v1090_v60 }
 0x1db   : > { %v1098_v1 = vadd.f32 %v1096_v58, %v1002_v54  ;;  %v1709_v54 = vld [vmem:[#allocation7 + $0x80] sm:$0xff] }
 0x1dc   : > { %v1099_v3 = vadd.f32 %v1097_v63, %v1003_v56  ;;  %v1795_v63 = vld [vmem:[#allocation7 + $0x88] sm:$0xff] }
 0x1dd   : > { %v1100_v4 = vmax.f32 %v1098_v1, 0.0 }
 0x1de   : > { %v1101_v5 = vmax.f32 %v1099_v3, 0.0 }
 0x1df   : > { %1272 = vrot.lane.b32.xlu0 %v1100_v4, %s3954_s23  ;;  %1186 = vrot.lane.b32.xlu1 %v1100_v4, %s3955_s21 }
 0x1e0   : > { %1115 = vmatprep.subr.mxu1 %v1101_v5 }
 0x1e1   : > { %1116 = vmatpush1.msra.mxu1 %v1100_v4 }
 0x1e2   : > { %3553 = vmatmul.mubr.msk.f32.vlgmr.msra.gmra.mrb[8].mxu1 %vm1111_vm9, %v1105_v6 }
 0x1e3   : > { %1358 = vrot.lane.b32.xlu0 %v1100_v4, %s3956_s11  ;;  %1188 = vrot.lane.b32.xlu1 %v1101_v5, %s3955_s21 }
 0x1e4   : > { %1347 = vmatprep.mubr.f32.mxu1 %v3953_v0 }
 0x1e7   : > { %1444 = vrot.lane.b32.xlu0 %v1100_v4, %s3957_s12  ;;  %1274 = vrot.lane.b32.xlu1 %v1101_v5, %s3954_s23 }
 0x1eb   : > { %1530 = vrot.lane.b32.xlu0 %v1100_v4, %s3958_s6  ;;  %1360 = vrot.lane.b32.xlu1 %v1101_v5, %s3956_s11 }
 0x1ef   : > { %1616 = vrot.lane.b32.xlu0 %v1100_v4, %s3959_s7  ;;  %1446 = vrot.lane.b32.xlu1 %v1101_v5, %s3957_s12 }
 0x1f3   : > { %1702 = vrot.lane.b32.xlu0 %v1100_v4, %s3960_s8  ;;  %1532 = vrot.lane.b32.xlu1 %v1101_v5, %s3958_s6 }
 0x1f7   : > { %1788 = vrot.lane.b32.xlu0 %v1100_v4, %s3962_s9  ;;  %1618 = vrot.lane.b32.xlu1 %v1101_v5, %s3959_s7 }
 0x1fb   : > { %1108 = vperm.xlu0 %3786, %v3552_v7   ;;  %1704 = vrot.lane.b32.xlu1 %v1101_v5, %s3960_s8 }
 0x1ff   : > { %1790 = vrot.lane.b32.xlu1 %v1101_v5, %s3962_s9 }
 0x251   : > { %v1273_v8 = vpop.permute.xlu0 %1272  ;;  %v1187_v10 = vpop.permute.xlu1 %1186 }
 0x255   : > { %v1359_v11 = vpop.permute.xlu0 %1358  ;;  %v1189_v14 = vpop.permute.xlu1 %1188 }
 0x256   : > { %v1191_v15 = vsel %vm342_vm2, %v1189_v14, %v1187_v10  ;;  %v1190_v17 = vsel %vm342_vm2, %v1187_v10, %v1189_v14 }
 0x257   : > { %1197 = vmatprep.subr.mxu0 %v1190_v17 }
 0x258   : > { %1198 = vmatpush1.msra.mxu0 %v1191_v15 }
 0x259   : > { %v1445_v19 = vpop.permute.xlu0 %1444  ;;  %3554 = vmatmul.mubr.msk.f32.vlgmr.msra.gmra.mrb[10].mxu0 %vm1111_vm9, %v1193_v18  ;;  %v1275_v21 = vpop.permute.xlu1 %1274 }
 0x25a   : > { %v1277_v22 = vsel %vm436_vm1, %v1275_v21, %v1273_v8  ;;  %v1276_v23 = vsel %vm436_vm1, %v1273_v8, %v1275_v21  ;;  %1433 = vmatprep.mubr.f32.mxu0 %v3953_v0 }
 0x25b   : > { %1283 = vmatprep.subr.mxu1 %v1276_v23 }
 0x25c   : > { %1284 = vmatpush1.msra.mxu1 %v1277_v22 }
 0x25d   : > { %v1361_v25 = vpop.permute.xlu1 %1360  ;;  %3555 = vmatmul.mubr.msk.f32.vlgmr.msra.gmra.mrb[10].mxu1 %vm1111_vm9, %v1279_v24  ;;  %v1531_v30 = vpop.permute.xlu0 %1530 }
 0x25e   : > { %v1363_v26 = vsel %vm532_vm3, %v1361_v25, %v1359_v11  ;;  %v1362_v27 = vsel %vm532_vm3, %v1359_v11, %v1361_v25  ;;  %1519 = vmatprep.mubr.f32.mxu1 %v3953_v0 }
 0x25f   : > { %1369 = vmatprep.subr.mxu0 %v1362_v27 }
 0x260   : > { %1370 = vmatpush1.msra.mxu0 %v1363_v26 }
 0x261   : > { %3556 = vmatmul.mubr.msk.f32.vlgmr.msra.gmra.mrb[12].mxu0 %vm1111_vm9, %v1365_v28  ;;  %v1447_v32 = vpop.permute.xlu1 %1446  ;;  %v1617_v36 = vpop.permute.xlu0 %1616 }
 0x262   : > { %v1449_v33 = vsel %vm628_vm4, %v1447_v32, %v1445_v19  ;;  %v1448_v34 = vsel %vm628_vm4, %v1445_v19, %v1447_v32  ;;  %1605 = vmatprep.mubr.f32.mxu0 %v3953_v0 }
 0x263   : > { %1455 = vmatprep.subr.mxu1 %v1448_v34 }
 0x264   : > { %1456 = vmatpush1.msra.mxu1 %v1449_v33 }
 0x265   : > { %v1533_v38 = vpop.permute.xlu1 %1532  ;;  %3557 = vmatmul.mubr.msk.f32.vlgmr.msra.gmra.mrb[12].mxu1 %vm1111_vm9, %v1451_v35  ;;  %v1703_v49 = vpop.permute.xlu0 %1702 }
 0x266   : > { %v1534_v40 = vsel %vm724_vm5, %v1531_v30, %v1533_v38  ;;  %v1535_v41 = vsel %vm724_vm5, %v1533_v38, %v1531_v30  ;;  %1691 = vmatprep.mubr.f32.mxu1 %v3953_v0 }
 0x267   : > { %1541 = vmatprep.subr.mxu0 %v1535_v41 }
 0x268   : > { %1542 = vmatpush1.msra.mxu0 %v1534_v40 }
 0x269   : > { %3558 = vmatmul.mubr.msk.f32.vlgmr.msra.gmra.mrb[14].mxu0 %vm1111_vm9, %v1537_v42  ;;  %v1619_v43 = vpop.permute.xlu1 %1618  ;;  %v1789_v56 = vpop.permute.xlu0 %1788 }
 0x26a   : > { %v1620_v44 = vsel %vm820_vm6, %v1617_v36, %v1619_v43  ;;  %v1621_v46 = vsel %vm820_vm6, %v1619_v43, %v1617_v36  ;;  %1777 = vmatprep.mubr.f32.mxu0 %v3953_v0 }
 0x26b   : > { %1627 = vmatprep.subr.mxu1 %v1621_v46 }
 0x26c   : > { %1628 = vmatpush1.msra.mxu1 %v1620_v44 }
 0x26d   : > { %v1705_v50 = vpop.permute.xlu1 %1704  ;;  %3559 = vmatmul.mubr.msk.f32.vlgmr.msra.gmra.mrb[14].mxu1 %vm1111_vm9, %v1623_v48 }
 0x26e   : > { %v1706_v51 = vsel %vm916_vm7, %v1703_v49, %v1705_v50  ;;  %v1707_v52 = vsel %vm916_vm7, %v1705_v50, %v1703_v49  ;;  %1863 = vmatprep.mubr.f32.mxu1 %v3953_v0 }
 0x26f   : > { %1713 = vmatprep.subr.mxu0 %v1707_v52 }
 0x270   : > { %1714 = vmatpush1.msra.mxu0 %v1706_v51 }
 0x271   : > { %3560 = vmatmul.mubr.msk.f32.vlgmr.msra.gmra.mrb[16].mxu0 %vm1111_vm9, %v1709_v54  ;;  %v1791_v57 = vpop.permute.xlu1 %1790 }
 0x272   : > { %v1792_v58 = vsel %vm1012_vm8, %v1789_v56, %v1791_v57  ;;  %v1793_v60 = vsel %vm1012_vm8, %v1791_v57, %v1789_v56  ;;  %1952 = vmatprep.mubr.f32.mxu0 %v3953_v0 }
 0x273   : > { %1799 = vmatprep.subr.mxu1 %v1793_v60 }
 0x274   : > { %1800 = vmatpush1.msra.mxu1 %v1792_v58 }
 0x275   : > { %3561 = vmatmul.mubr.msk.f32.vlgmr.msra.gmra.mrb[16].mxu1 %vm1111_vm9, %v1795_v63 }
 0x276   : > { %2034 = vmatprep.mubr.f32.mxu1 %v3953_v0 }
 0x27a   : > { %v1109_v4 = vpop.permute.xlu0 %1108 }
 0x2b5   : > { %v1181_v1 = vpop.f32.mrb[8].mxu1 }
 0x2b6   : > { %v1183_v3 = vpop.f32.mrb[9].mxu1  ;;  %v1182_v6 = vadd.f32 %v1181_v1, %v1109_v4 }
 0x2b7   : > { %v1184_v10 = vadd.f32 %v1183_v3, %v1109_v4 }
 0x32c   : > { %v1263_v5 = vpop.f32.mrb[10].mxu0 }
 0x32d   : > { %v1268_v7 = vmul.f32 %v1263_v5, %v4292_v59  ;;  %v1265_v8 = vpop.f32.mrb[11].mxu0 }
 0x32e   : > { %v1269_v11 = vmul.f32 %v1265_v8, %v4294_v61 }
 0x32f   : > { %v1270_v14 = vadd.f32 %v1268_v7, %v1182_v6 }
 0x330   : > { %v1271_v15 = vadd.f32 %v1269_v11, %v1184_v10  ;;  %v1349_v17 = vpop.f32.mrb[10].mxu1 }
 0x331   : > { %v1354_v18 = vmul.f32 %v1349_v17, %v4296_v62  ;;  %v1351_v19 = vpop.f32.mrb[11].mxu1 }
 0x332   : > { %v1355_v21 = vmul.f32 %v1351_v19, %v4298_v2 }
 0x333   : > { %v1356_v22 = vadd.f32 %v1354_v18, %v1270_v14  ;;  %v1879_v14 = vld [vmem:[#allocation7 + $0xb0] sm:$0xff] }
 0x334   : > { %v1357_v23 = vadd.f32 %v1355_v21, %v1271_v15  ;;  %v1435_v24 = vpop.f32.mrb[12].mxu0  ;;  %v3562_v15 = vld [vmem:[%s4669_s3 + $0x10] sm:$0xff] }
 0x335   : > { %v1440_v25 = vmul.f32 %v1435_v24, %v4303_v9  ;;  %v1437_v26 = vpop.f32.mrb[13].mxu0 }
 0x336   : > { %v1441_v27 = vmul.f32 %v1437_v26, %v4306_v12 }
 0x337   : > { %v1442_v28 = vadd.f32 %v1440_v25, %v1356_v22  ;;  %v1966_v22 = vld [vmem:[#allocation7 + $0x90] sm:$0xff] }
 0x338   : > { %v1443_v30 = vadd.f32 %v1441_v27, %v1357_v23  ;;  %v1521_v32 = vpop.f32.mrb[12].mxu1  ;;  %v2052_v27 = vld [vmem:[#allocation7 + $0x98] sm:$0xff] }
 0x339   : > { %v1526_v33 = vmul.f32 %v1521_v32, %v4308_v16  ;;  %v1523_v34 = vpop.f32.mrb[13].mxu1 }
 0x33a   : > { %v1527_v35 = vmul.f32 %v1523_v34, %v4311_v20  ;;  %v2138_v34 = vld [vmem:[#allocation7 + $0xa0] sm:$0xff] }
 0x33b   : > { %v1528_v36 = vadd.f32 %v1526_v33, %v1442_v28 }
 0x33c   : > { %v1529_v38 = vadd.f32 %v1527_v35, %v1443_v30  ;;  %v1607_v40 = vpop.f32.mrb[14].mxu0 }
 0x33d   : > { %v1612_v41 = vmul.f32 %v1607_v40, %v4316_v29  ;;  %v1609_v42 = vpop.f32.mrb[15].mxu0 }
 0x33e   : > { %v1613_v43 = vmul.f32 %v1609_v42, %v4318_v31 }
 0x33f   : > { %v1614_v44 = vadd.f32 %v1612_v41, %v1528_v36  ;;  %v2224_v41 = vld [vmem:[#allocation7 + $0xa8] sm:$0xff] }
 0x340   : > { %v1615_v46 = vadd.f32 %v1613_v43, %v1529_v38  ;;  %v1693_v48 = vpop.f32.mrb[14].mxu1 }
 0x341   : > { %v1698_v49 = vmul.f32 %v1693_v48, %v4322_v37  ;;  %v1695_v50 = vpop.f32.mrb[15].mxu1  ;;  %v2310_v48 = vld [vmem:[#allocation7 + $0xb8] sm:$0xff] }
 0x342   : > { %v1699_v51 = vmul.f32 %v1695_v50, %v4324_v39 }
 0x343   : > { %v1700_v52 = vadd.f32 %v1698_v49, %v1614_v44 }
 0x344   : > { %v1701_v54 = vadd.f32 %v1699_v51, %v1615_v46  ;;  %v1779_v56 = vpop.f32.mrb[16].mxu0 }
 0x345   : > { %v1784_v57 = vmul.f32 %v1779_v56, %v4328_v45  ;;  %v1781_v58 = vpop.f32.mrb[17].mxu0 }
 0x346   : > { %v1785_v60 = vmul.f32 %v1781_v58, %v4330_v47 }
 0x347   : > { %v1786_v63 = vadd.f32 %v1784_v57, %v1700_v52 }
 0x348   : > { %v1787_v1 = vadd.f32 %v1785_v60, %v1701_v54  ;;  %v1865_v3 = vpop.f32.mrb[16].mxu1  ;;  %v2396_v54 = vld [vmem:[#allocation7 + $0xc0] sm:$0xff] }
 0x349   : > { %v1870_v4 = vmul.f32 %v1865_v3, %v4334_v53  ;;  %v1867_v5 = vpop.f32.mrb[17].mxu1 }
 0x34a   : > { %v1871_v6 = vmul.f32 %v1867_v5, %v4336_v55 }
 0x34b   : > { %v1872_v7 = vadd.f32 %v1870_v4, %v1786_v63  ;;  %v2482_v63 = vld [vmem:[#allocation7 + $0xc8] sm:$0xff] }
 0x34c   : > { %v1873_v8 = vadd.f32 %v1871_v6, %v1787_v1  ;;  %v2568_v6 = vld [vmem:[#allocation7 + $0xd0] sm:$0xff] }
 0x34d   : > { %v4425_v10 = vmax.f32 %v1872_v7, 0.0 }
 0x34e   : > { %v4427_v11 = vmax.f32 %v1873_v8, 0.0 }
 0x34f   : > { %1959 = vrot.lane.b32.xlu1 %v4425_v10, %s3955_s21 }
 0x350   : > { %1961 = vrot.lane.b32.xlu0 %v4427_v11, %s3955_s21  ;;  %1888 = vmatprep.subr.mxu0 %v4427_v11 }
 0x351   : > { %1889 = vmatpush1.msra.mxu0 %v4425_v10 }
 0x352   : > { %3563 = vmatmul.mubr.msk.f32.vlgmr.msra.gmra.mrb[18].mxu0 %vm1111_vm9, %v1879_v14 }
 0x353   : > { %2045 = vrot.lane.b32.xlu1 %v4425_v10, %s3954_s23  ;;  %2120 = vmatprep.mubr.f32.mxu0 %v3953_v0 }
 0x354   : > { %2047 = vrot.lane.b32.xlu0 %v4427_v11, %s3954_s23 }
 0x357   : > { %2131 = vrot.lane.b32.xlu1 %v4425_v10, %s3956_s11 }
 0x358   : > { %2133 = vrot.lane.b32.xlu0 %v4427_v11, %s3956_s11 }
 0x35b   : > { %2217 = vrot.lane.b32.xlu1 %v4425_v10, %s3957_s12 }
 0x35c   : > { %2219 = vrot.lane.b32.xlu0 %v4427_v11, %s3957_s12 }
 0x35f   : > { %2303 = vrot.lane.b32.xlu1 %v4425_v10, %s3958_s6 }
 0x360   : > { %2305 = vrot.lane.b32.xlu0 %v4427_v11, %s3958_s6 }
 0x363   : > { %2389 = vrot.lane.b32.xlu1 %v4425_v10, %s3959_s7 }
 0x364   : > { %2391 = vrot.lane.b32.xlu0 %v4427_v11, %s3959_s7 }
 0x367   : > { %2475 = vrot.lane.b32.xlu1 %v4425_v10, %s3960_s8 }
 0x368   : > { %2477 = vrot.lane.b32.xlu0 %v4427_v11, %s3960_s8 }
 0x36b   : > { %2561 = vrot.lane.b32.xlu1 %v4425_v10, %s3962_s9 }
 0x36c   : > { %2563 = vrot.lane.b32.xlu0 %v4427_v11, %s3962_s9 }
 0x36f   : > { %1882 = vperm.xlu1 %3787, %v3562_v15  }
 0x3c1   : > { %v1960_v17 = vpop.permute.xlu1 %1959 }
 0x3c2   : > { %v1962_v18 = vpop.permute.xlu0 %1961 }
 0x3c3   : > { %v1964_v19 = vsel %vm342_vm2, %v1962_v18, %v1960_v17  ;;  %v1963_v21 = vsel %vm342_vm2, %v1960_v17, %v1962_v18 }
 0x3c4   : > { %1970 = vmatprep.subr.mxu1 %v1963_v21 }
 0x3c5   : > { %1971 = vmatpush1.msra.mxu1 %v1964_v19  ;;  %v2046_v23 = vpop.permute.xlu1 %2045 }
 0x3c6   : > { %v2048_v24 = vpop.permute.xlu0 %2047  ;;  %3564 = vmatmul.mubr.msk.f32.vlgmr.msra.gmra.mrb[18].mxu1 %vm1111_vm9, %v1966_v22 }
 0x3c7   : > { %v2050_v25 = vsel %vm436_vm1, %v2048_v24, %v2046_v23  ;;  %v2049_v26 = vsel %vm436_vm1, %v2046_v23, %v2048_v24  ;;  %2206 = vmatprep.mubr.f32.mxu1 %v3953_v0 }
 0x3c8   : > { %2056 = vmatprep.subr.mxu0 %v2049_v26 }
 0x3c9   : > { %v2132_v28 = vpop.permute.xlu1 %2131  ;;  %2057 = vmatpush1.msra.mxu0 %v2050_v25 }
 0x3ca   : > { %v2134_v30 = vpop.permute.xlu0 %2133  ;;  %3565 = vmatmul.mubr.msk.f32.vlgmr.msra.gmra.mrb[20].mxu0 %vm1111_vm9, %v2052_v27 }
 0x3cb   : > { %v2136_v32 = vsel %vm532_vm3, %v2134_v30, %v2132_v28  ;;  %v2135_v33 = vsel %vm532_vm3, %v2132_v28, %v2134_v30  ;;  %2292 = vmatprep.mubr.f32.mxu0 %v3953_v0 }
 0x3cc   : > { %2142 = vmatprep.subr.mxu1 %v2135_v33 }
 0x3cd   : > { %2143 = vmatpush1.msra.mxu1 %v2136_v32  ;;  %v2218_v35 = vpop.permute.xlu1 %2217 }
 0x3ce   : > { %v2220_v36 = vpop.permute.xlu0 %2219  ;;  %3566 = vmatmul.mubr.msk.f32.vlgmr.msra.gmra.mrb[20].mxu1 %vm1111_vm9, %v2138_v34 }
 0x3cf   : > { %v2222_v38 = vsel %vm628_vm4, %v2220_v36, %v2218_v35  ;;  %v2221_v40 = vsel %vm628_vm4, %v2218_v35, %v2220_v36  ;;  %2378 = vmatprep.mubr.f32.mxu1 %v3953_v0 }
 0x3d0   : > { %2228 = vmatprep.subr.mxu0 %v2221_v40 }
 0x3d1   : > { %v2304_v42 = vpop.permute.xlu1 %2303  ;;  %2229 = vmatpush1.msra.mxu0 %v2222_v38 }
 0x3d2   : > { %v2306_v43 = vpop.permute.xlu0 %2305  ;;  %3567 = vmatmul.mubr.msk.f32.vlgmr.msra.gmra.mrb[22].mxu0 %vm1111_vm9, %v2224_v41 }
 0x3d3   : > { %v2307_v44 = vsel %vm724_vm5, %v2304_v42, %v2306_v43  ;;  %v2308_v46 = vsel %vm724_vm5, %v2306_v43, %v2304_v42  ;;  %2464 = vmatprep.mubr.f32.mxu0 %v3953_v0 }
 0x3d4   : > { %2314 = vmatprep.subr.mxu1 %v2308_v46 }
 0x3d5   : > { %2315 = vmatpush1.msra.mxu1 %v2307_v44  ;;  %v2390_v49 = vpop.permute.xlu1 %2389 }
 0x3d6   : > { %v2392_v50 = vpop.permute.xlu0 %2391  ;;  %3568 = vmatmul.mubr.msk.f32.vlgmr.msra.gmra.mrb[22].mxu1 %vm1111_vm9, %v2310_v48 }
 0x3d7   : > { %v2393_v51 = vsel %vm820_vm6, %v2390_v49, %v2392_v50  ;;  %v2394_v52 = vsel %vm820_vm6, %v2392_v50, %v2390_v49  ;;  %2550 = vmatprep.mubr.f32.mxu1 %v3953_v0 }
 0x3d8   : > { %2400 = vmatprep.subr.mxu0 %v2394_v52 }
 0x3d9   : > { %v2476_v56 = vpop.permute.xlu1 %2475  ;;  %2401 = vmatpush1.msra.mxu0 %v2393_v51 }
 0x3da   : > { %v2478_v57 = vpop.permute.xlu0 %2477  ;;  %3569 = vmatmul.mubr.msk.f32.vlgmr.msra.gmra.mrb[24].mxu0 %vm1111_vm9, %v2396_v54 }
 0x3db   : > { %v2479_v58 = vsel %vm916_vm7, %v2476_v56, %v2478_v57  ;;  %v2480_v60 = vsel %vm916_vm7, %v2478_v57, %v2476_v56  ;;  %2636 = vmatprep.mubr.f32.mxu0 %v3953_v0 }
 0x3dc   : > { %2486 = vmatprep.subr.mxu1 %v2480_v60 }
 0x3dd   : > { %2487 = vmatpush1.msra.mxu1 %v2479_v58  ;;  %v2562_v1 = vpop.permute.xlu1 %2561 }
 0x3de   : > { %v2564_v3 = vpop.permute.xlu0 %2563  ;;  %3570 = vmatmul.mubr.msk.f32.vlgmr.msra.gmra.mrb[24].mxu1 %vm1111_vm9, %v2482_v63 }
 0x3df   : > { %v2565_v4 = vsel %vm1012_vm8, %v2562_v1, %v2564_v3  ;;  %v2566_v5 = vsel %vm1012_vm8, %v2564_v3, %v2562_v1  ;;  %2725 = vmatprep.mubr.f32.mxu1 %v3953_v0 }
 0x3e0   : > { %2572 = vmatprep.subr.mxu0 %v2566_v5 }
 0x3e1   : > { %2573 = vmatpush1.msra.mxu0 %v2565_v4 }
 0x3e2   : > { %3571 = vmatmul.mubr.msk.f32.vlgmr.msra.gmra.mrb[26].mxu0 %vm1111_vm9, %v2568_v6 }
 0x3e3   : > { %2807 = vmatprep.mubr.f32.mxu0 %v3953_v0 }
 0x3ee   : > { %v1883_v14 = vpop.permute.xlu1 %1882 }
 0x425   : > { %v1954_v7 = vpop.f32.mrb[18].mxu0 }
 0x426   : > { %v1956_v8 = vpop.f32.mrb[19].mxu0  ;;  %v1955_v15 = vadd.f32 %v1954_v7, %v1883_v14 }
 0x427   : > { %v1957_v18 = vadd.f32 %v1956_v8, %v1883_v14 }
 0x499   : > { %v2036_v17 = vpop.f32.mrb[18].mxu1 }
 0x49a   : > { %v2041_v19 = vmul.f32 %v2036_v17, %v4292_v59  ;;  %v2038_v21 = vpop.f32.mrb[19].mxu1 }
 0x49b   : > { %v2042_v22 = vmul.f32 %v2038_v21, %v4294_v61 }
 0x49c   : > { %v2043_v23 = vadd.f32 %v2041_v19, %v1955_v15 }
 0x49d   : > { %v2044_v24 = vadd.f32 %v2042_v22, %v1957_v18  ;;  %v2122_v25 = vpop.f32.mrb[20].mxu0 }
 0x49e   : > { %v2127_v26 = vmul.f32 %v2122_v25, %v4296_v62  ;;  %v2124_v27 = vpop.f32.mrb[21].mxu0  ;;  %v2652_v25 = vld [vmem:[#allocation7 + $0xf8] sm:$0xff] }
 0x49f   : > { %v2128_v28 = vmul.f32 %v2124_v27, %v4298_v2 }
 0x4a0   : > { %v2129_v30 = vadd.f32 %v2127_v26, %v2043_v23  ;;  %v3572_v26 = vld [vmem:[%s4669_s3 + $0x18] sm:$0xff] }
 0x4a1   : > { %v2130_v32 = vadd.f32 %v2128_v28, %v2044_v24  ;;  %v2208_v33 = vpop.f32.mrb[20].mxu1 }
 0x4a2   : > { %v2213_v34 = vmul.f32 %v2208_v33, %v4303_v9  ;;  %v2210_v35 = vpop.f32.mrb[21].mxu1  ;;  %v2739_v33 = vld [vmem:[#allocation7 + $0xd8] sm:$0xff] }
 0x4a3   : > { %v2214_v36 = vmul.f32 %v2210_v35, %v4306_v12 }
 0x4a4   : > { %v2215_v38 = vadd.f32 %v2213_v34, %v2129_v30 }
 0x4a5   : > { %v2216_v40 = vadd.f32 %v2214_v36, %v2130_v32  ;;  %v2294_v41 = vpop.f32.mrb[22].mxu0 }
 0x4a6   : > { %v2299_v42 = vmul.f32 %v2294_v41, %v4308_v16  ;;  %v2296_v43 = vpop.f32.mrb[23].mxu0 }
 0x4a7   : > { %v2300_v44 = vmul.f32 %v2296_v43, %v4311_v20 }
 0x4a8   : > { %v2301_v46 = vadd.f32 %v2299_v42, %v2215_v38 }
 0x4a9   : > { %v2302_v48 = vadd.f32 %v2300_v44, %v2216_v40  ;;  %v2380_v49 = vpop.f32.mrb[22].mxu1  ;;  %v2825_v40 = vld [vmem:[#allocation7 + $0xe0] sm:$0xff] }
 0x4aa   : > { %v2385_v50 = vmul.f32 %v2380_v49, %v4316_v29  ;;  %v2382_v51 = vpop.f32.mrb[23].mxu1 }
 0x4ab   : > { %v2386_v52 = vmul.f32 %v2382_v51, %v4318_v31 }
 0x4ac   : > { %v2387_v54 = vadd.f32 %v2385_v50, %v2301_v46  ;;  %v2911_v46 = vld [vmem:[#allocation7 + $0xe8] sm:$0xff] }
 0x4ad   : > { %v2388_v56 = vadd.f32 %v2386_v52, %v2302_v48  ;;  %v2466_v57 = vpop.f32.mrb[24].mxu0  ;;  %v2997_v52 = vld [vmem:[#allocation7 + $0xf0] sm:$0xff] }
 0x4ae   : > { %v2471_v58 = vmul.f32 %v2466_v57, %v4322_v37  ;;  %v2468_v60 = vpop.f32.mrb[25].mxu0 }
 0x4af   : > { %v2472_v63 = vmul.f32 %v2468_v60, %v4324_v39  ;;  %v3083_v60 = vld [vmem:[#allocation7 + $0x100] sm:$0xff] }
 0x4b0   : > { %v2473_v1 = vadd.f32 %v2471_v58, %v2387_v54 }
 0x4b1   : > { %v2474_v3 = vadd.f32 %v2472_v63, %v2388_v56  ;;  %v2552_v4 = vpop.f32.mrb[24].mxu1 }
 0x4b2   : > { %v2557_v5 = vmul.f32 %v2552_v4, %v4328_v45  ;;  %v2554_v6 = vpop.f32.mrb[25].mxu1 }
 0x4b3   : > { %v2558_v7 = vmul.f32 %v2554_v6, %v4330_v47 }
 0x4b4   : > { %v2559_v8 = vadd.f32 %v2557_v5, %v2473_v1  ;;  %v3169_v5 = vld [vmem:[#allocation7 + $0x108] sm:$0xff] }
 0x4b5   : > { %v2560_v14 = vadd.f32 %v2558_v7, %v2474_v3  ;;  %v2638_v15 = vpop.f32.mrb[26].mxu0 }
 0x4b6   : > { %v2643_v17 = vmul.f32 %v2638_v15, %v4334_v53  ;;  %v2640_v18 = vpop.f32.mrb[27].mxu0  ;;  %v3255_v15 = vld [vmem:[#allocation7 + $0x110] sm:$0xff] }
 0x4b7   : > { %v2644_v19 = vmul.f32 %v2640_v18, %v4336_v55 }
 0x4b8   : > { %v2645_v21 = vadd.f32 %v2643_v17, %v2559_v8 }
 0x4b9   : > { %v2646_v22 = vadd.f32 %v2644_v19, %v2560_v14 }
 0x4ba   : > { %v2647_v23 = vmax.f32 %v2645_v21, 0.0 }
 0x4bb   : > { %v2648_v24 = vmax.f32 %v2646_v22, 0.0  ;;  %v3341_v22 = vld [vmem:[#allocation7 + $0x118] sm:$0xff] }
 0x4bc   : > { %2732 = vrot.lane.b32.xlu0 %v2647_v23, %s3955_s21 }
 0x4bd   : > { %2734 = vrot.lane.b32.xlu1 %v2648_v24, %s3955_s21  ;;  %2661 = vmatprep.subr.mxu1 %v2648_v24  ;;  %s3588_s21 = sshll.u32 %s4010_s19, 8 }
 0x4be   : > { %2662 = vmatpush1.msra.mxu1 %v2647_v23 }
 0x4bf   : > { %3573 = vmatmul.mubr.msk.f32.vlgmr.msra.gmra.mrb[26].mxu1 %vm1111_vm9, %v2652_v25 }
 0x4c0   : > { %2818 = vrot.lane.b32.xlu0 %v2647_v23, %s3954_s23  ;;  %2893 = vmatprep.mubr.f32.mxu1 %v3953_v0 }
 0x4c1   : > { %2820 = vrot.lane.b32.xlu1 %v2648_v24, %s3954_s23  ;;  %s3542_s23 = sshll.u32 %s4167_s10, 4 }
 0x4c4   : > { %2904 = vrot.lane.b32.xlu0 %v2647_v23, %s3956_s11 }
 0x4c5   : > { %2906 = vrot.lane.b32.xlu1 %v2648_v24, %s3956_s11  ;;  %s244_s11 = scalar_lea.vmem [#allocation8], %s3542_s23 }
 0x4c8   : > { %2990 = vrot.lane.b32.xlu0 %v2647_v23, %s3957_s12 }
 0x4c9   : > { %2992 = vrot.lane.b32.xlu1 %v2648_v24, %s3957_s12  ;;  %s3441_s12 = sshll.u32 %s244_s11, 4  ;;  %s4624_s12 = int_to_ptr.vmem [resolvable:$true] %s3441_s12 }
 0x4ca   : > { %s3874_s19 = scalar_lea.vmem %s4624_s12, 256  ;;  %p3881_p5 = scmp.lt.s32.totalorder %s4624_s12, %s3879_s26 }
 0x4cb   : > { %p3875_p8 = scmp.ne.s32.totalorder %s4624_s12, %s3874_s19  ;;  %p3882_p9 = scmp.lt.s32.totalorder %s3880_s5, %s3874_s19 }
 0x4cc   : > { %3076 = vrot.lane.b32.xlu0 %v2647_v23, %s3958_s6 }
 0x4cd   : > { %3078 = vrot.lane.b32.xlu1 %v2648_v24, %s3958_s6  ;;  %p3876_p2 = pnand %p3875_p8, %p4684_p0  ;;  %p3883_p12 = por %p3882_p9, %p3881_p5 }
 0x4cf   : > { %p3877_p3 = pneg %p3876_p2 }
 0x4d0   : > { %3162 = vrot.lane.b32.xlu0 %v2647_v23, %s3959_s7 }
 0x4d1   : > { %3164 = vrot.lane.b32.xlu1 %v2648_v24, %s3959_s7  ;;  %p3884_p1 = pnand %p3883_p12, %p3877_p3 }
 0x4d4   : > { %3248 = vrot.lane.b32.xlu0 %v2647_v23, %s3960_s8 }
 0x4d5   : > { %3250 = vrot.lane.b32.xlu1 %v2648_v24, %s3960_s8  ;;  %s4622_s8 = scalar_lea.hbm %s4670_s4, %s3588_s21 }
 0x4d8   : > { %3334 = vrot.lane.b32.xlu0 %v2647_v23, %s3962_s9 }
 0x4d9   : > { %3336 = vrot.lane.b32.xlu1 %v2648_v24, %s3962_s9  ;;  %s3427_s9 = scalar_lea.sflag [#allocation4], %s4167_s10 }
 0x4dc   : > { %2655 = vperm.xlu0 %3786, %v3572_v26  }
 0x52e   : > { %v2733_v27 = vpop.permute.xlu0 %2732 }
 0x52f   : > { %v2735_v28 = vpop.permute.xlu1 %2734 }
 0x530   : > { %v2737_v30 = vsel %vm342_vm2, %v2735_v28, %v2733_v27  ;;  %v2736_v32 = vsel %vm342_vm2, %v2733_v27, %v2735_v28 }
 0x531   : > { %2743 = vmatprep.subr.mxu0 %v2736_v32 }
 0x532   : > { %2744 = vmatpush1.msra.mxu0 %v2737_v30  ;;  %v2819_v34 = vpop.permute.xlu0 %2818 }
 0x533   : > { %v2821_v35 = vpop.permute.xlu1 %2820  ;;  %3574 = vmatmul.mubr.msk.f32.vlgmr.msra.gmra.mrb[28].mxu0 %vm1111_vm9, %v2739_v33 }
 0x534   : > { %v2823_v36 = vsel %vm436_vm1, %v2821_v35, %v2819_v34  ;;  %v2822_v38 = vsel %vm436_vm1, %v2819_v34, %v2821_v35  ;;  %2979 = vmatprep.mubr.f32.mxu0 %v3953_v0 }
 0x535   : > { %2829 = vmatprep.subr.mxu1 %v2822_v38 }
 0x536   : > { %v2905_v41 = vpop.permute.xlu0 %2904  ;;  %2830 = vmatpush1.msra.mxu1 %v2823_v36 }
 0x537   : > { %v2907_v42 = vpop.permute.xlu1 %2906  ;;  %3575 = vmatmul.mubr.msk.f32.vlgmr.msra.gmra.mrb[28].mxu1 %vm1111_vm9, %v2825_v40 }
 0x538   : > { %v2909_v43 = vsel %vm532_vm3, %v2907_v42, %v2905_v41  ;;  %v2908_v44 = vsel %vm532_vm3, %v2905_v41, %v2907_v42  ;;  %3065 = vmatprep.mubr.f32.mxu1 %v3953_v0 }
 0x539   : > { %2915 = vmatprep.subr.mxu0 %v2908_v44 }
 0x53a   : > { %2916 = vmatpush1.msra.mxu0 %v2909_v43  ;;  %v2991_v48 = vpop.permute.xlu0 %2990 }
 0x53b   : > { %v2993_v49 = vpop.permute.xlu1 %2992  ;;  %3576 = vmatmul.mubr.msk.f32.vlgmr.msra.gmra.mrb[30].mxu0 %vm1111_vm9, %v2911_v46 }
 0x53c   : > { %v2995_v50 = vsel %vm628_vm4, %v2993_v49, %v2991_v48  ;;  %v2994_v51 = vsel %vm628_vm4, %v2991_v48, %v2993_v49  ;;  %3151 = vmatprep.mubr.f32.mxu0 %v3953_v0 }
 0x53d   : > { %3001 = vmatprep.subr.mxu1 %v2994_v51 }
 0x53e   : > { %v3077_v54 = vpop.permute.xlu0 %3076  ;;  %3002 = vmatpush1.msra.mxu1 %v2995_v50 }
 0x53f   : > { %v3079_v56 = vpop.permute.xlu1 %3078  ;;  %3577 = vmatmul.mubr.msk.f32.vlgmr.msra.gmra.mrb[30].mxu1 %vm1111_vm9, %v2997_v52 }
 0x540   : > { %v3080_v57 = vsel %vm724_vm5, %v3077_v54, %v3079_v56  ;;  %v3081_v58 = vsel %vm724_vm5, %v3079_v56, %v3077_v54  ;;  %3237 = vmatprep.mubr.f32.mxu1 %v3953_v0 }
 0x541   : > { %3087 = vmatprep.subr.mxu0 %v3081_v58 }
 0x542   : > { %3088 = vmatpush1.msra.mxu0 %v3080_v57  ;;  %v3163_v63 = vpop.permute.xlu0 %3162 }
 0x543   : > { %v3165_v1 = vpop.permute.xlu1 %3164  ;;  %3578 = vmatmul.mubr.msk.f32.vlgmr.msra.gmra.mrb[32].mxu0 %vm1111_vm9, %v3083_v60 }
 0x544   : > { %v3166_v3 = vsel %vm820_vm6, %v3163_v63, %v3165_v1  ;;  %v3167_v4 = vsel %vm820_vm6, %v3165_v1, %v3163_v63  ;;  %3323 = vmatprep.mubr.f32.mxu0 %v3953_v0 }
 0x545   : > { %3173 = vmatprep.subr.mxu1 %v3167_v4 }
 0x546   : > { %v3249_v6 = vpop.permute.xlu0 %3248  ;;  %3174 = vmatpush1.msra.mxu1 %v3166_v3 }
 0x547   : > { %v3251_v7 = vpop.permute.xlu1 %3250  ;;  %3579 = vmatmul.mubr.msk.f32.vlgmr.msra.gmra.mrb[32].mxu1 %vm1111_vm9, %v3169_v5 }
 0x548   : > { %v3252_v8 = vsel %vm916_vm7, %v3249_v6, %v3251_v7  ;;  %v3253_v14 = vsel %vm916_vm7, %v3251_v7, %v3249_v6  ;;  %3409 = vmatprep.mubr.f32.mxu1 %v3953_v0 }
 0x549   : > { %3259 = vmatprep.subr.mxu0 %v3253_v14 }
 0x54a   : > { %3260 = vmatpush1.msra.mxu0 %v3252_v8  ;;  %v3335_v17 = vpop.permute.xlu0 %3334 }
 0x54b   : > { %v3337_v18 = vpop.permute.xlu1 %3336  ;;  %3580 = vmatmul.mubr.msk.f32.vlgmr.msra.gmra.mrb[34].mxu0 %vm1111_vm9, %v3255_v15 }
 0x54c   : > { %v3338_v19 = vsel %vm1012_vm8, %v3335_v17, %v3337_v18  ;;  %v3339_v21 = vsel %vm1012_vm8, %v3337_v18, %v3335_v17 }
 0x54d   : > { %3345 = vmatprep.subr.mxu1 %v3339_v21 }
 0x54e   : > { %3346 = vmatpush1.msra.mxu1 %v3338_v19 }
 0x54f   : > { %3581 = vmatmul.mubr.msk.f32.vlgmr.msra.gmra.mrb[34].mxu1 %vm1111_vm9, %v3341_v22 }
 0x55b   : > { %v2656_v0 = vpop.permute.xlu0 %2655 }
 0x592   : > { %v2727_v23 = vpop.f32.mrb[26].mxu1 }
 0x593   : > { %v2729_v24 = vpop.f32.mrb[27].mxu1  ;;  %v2728_v26 = vadd.f32 %v2727_v23, %v2656_v0 }
 0x594   : > { %v2730_v30 = vadd.f32 %v2729_v24, %v2656_v0 }
 0x606   : > { %v2809_v25 = vpop.f32.mrb[28].mxu0 }
 0x607   : > { %v2814_v27 = vmul.f32 %v2809_v25, %v4292_v59  ;;  %v2811_v28 = vpop.f32.mrb[29].mxu0 }
 0x608   : > { %v2815_v32 = vmul.f32 %v2811_v28, %v4294_v61 }
 0x609   : > { %v2816_v33 = vadd.f32 %v2814_v27, %v2728_v26 }
 0x60a   : > { %v2817_v34 = vadd.f32 %v2815_v32, %v2730_v30  ;;  %v2895_v13 = vpop.f32.mrb[28].mxu1 }
 0x60b   : > { %v2900_v35 = vmul.f32 %v2895_v13, %v4296_v62  ;;  %v2897_v36 = vpop.f32.mrb[29].mxu1 }
 0x60c   : > { %v2901_v38 = vmul.f32 %v2897_v36, %v4298_v2 }
 0x60d   : > { %v2902_v40 = vadd.f32 %v2900_v35, %v2816_v33 }
 0x60e   : > { %v2903_v41 = vadd.f32 %v2901_v38, %v2817_v34  ;;  %v2981_v42 = vpop.f32.mrb[30].mxu0 }
 0x60f   : > { %v2986_v43 = vmul.f32 %v2981_v42, %v4303_v9  ;;  %v2983_v44 = vpop.f32.mrb[31].mxu0 }
 0x610   : > { %v2987_v59 = vmul.f32 %v2983_v44, %v4306_v12 }
 0x611   : > { %v2988_v46 = vadd.f32 %v2986_v43, %v2902_v40 }
 0x612   : > { %v2989_v48 = vadd.f32 %v2987_v59, %v2903_v41  ;;  %v3067_v49 = vpop.f32.mrb[30].mxu1 }
 0x613   : > { %v3072_v61 = vmul.f32 %v3067_v49, %v4308_v16  ;;  %v3069_v50 = vpop.f32.mrb[31].mxu1 }
 0x614   : > { %v3073_v51 = vmul.f32 %v3069_v50, %v4311_v20 }
 0x615   : > { %v3074_v62 = vadd.f32 %v3072_v61, %v2988_v46 }
 0x616   : > { %v3075_v52 = vadd.f32 %v3073_v51, %v2989_v48  ;;  %v3153_v54 = vpop.f32.mrb[32].mxu0 }
 0x617   : > { %v3158_v2 = vmul.f32 %v3153_v54, %v4316_v29  ;;  %v3155_v56 = vpop.f32.mrb[33].mxu0 }
 0x618   : > { %v3159_v9 = vmul.f32 %v3155_v56, %v4318_v31 }
 0x619   : > { %v3160_v57 = vadd.f32 %v3158_v2, %v3074_v62 }
 0x61a   : > { %v3161_v58 = vadd.f32 %v3159_v9, %v3075_v52  ;;  %v3239_v12 = vpop.f32.mrb[32].mxu1 }
 0x61b   : > { %v3244_v60 = vmul.f32 %v3239_v12, %v4322_v37  ;;  %v3241_v63 = vpop.f32.mrb[33].mxu1 }
 0x61c   : > { %v3245_v16 = vmul.f32 %v3241_v63, %v4324_v39 }
 0x61d   : > { %v3246_v1 = vadd.f32 %v3244_v60, %v3160_v57 }
 0x61e   : > { %v3247_v20 = vadd.f32 %v3245_v16, %v3161_v58  ;;  %v3325_v3 = vpop.f32.mrb[34].mxu0 }
 0x61f   : > { %v3330_v4 = vmul.f32 %v3325_v3, %v4328_v45  ;;  %v3327_v5 = vpop.f32.mrb[35].mxu0 }
 0x620   : > { %v3331_v29 = vmul.f32 %v3327_v5, %v4330_v47 }
 0x621   : > { %v3332_v6 = vadd.f32 %v3330_v4, %v3246_v1 }
 0x622   : > { %v3333_v31 = vadd.f32 %v3331_v29, %v3247_v20  ;;  %v3411_v7 = vpop.f32.mrb[34].mxu1 }
 0x623   : > { %v3416_v8 = vmul.f32 %v3411_v7, %v4334_v53  ;;  %v3413_v37 = vpop.f32.mrb[35].mxu1 }
 0x624   : > { %v3417_v14 = vmul.f32 %v3413_v37, %v4336_v55 }
 0x625   : > { %v3418_v39 = vadd.f32 %v3416_v8, %v3332_v6 }
 0x626   : > { %v3419_v15 = vadd.f32 %v3417_v14, %v3333_v31 }
 0x627   : > { %v3420_v17 = vadd.f32 %v3418_v39, %v4425_v10 }
 0x628   : > { %v3421_v45 = vadd.f32 %v3419_v15, %v4427_v11 }
 0x629   : > { %v3422_v47 = vmax.f32 %v3420_v17, 0.0 }
 0x62a   : > { %v3423_v18 = vmax.f32 %v3421_v45, 0.0 }
 0x62b   : > { %3424 = vst [vmem:[%s244_s11] sm:$0xff] %v3422_v47 }
 0x62c   : > { %3425 = vst [vmem:[%s244_s11 + $0x8] sm:$0xff] %v3423_v18 }
 0x62d   : > { %3887 = shalt.err (!%p3884_p1)
}
 0x62e   : > { %s3888_s10 = scalar_lea.hbm %s4622_s8, 256  ;;  %s3892_s20 = scalar_lea.hbm %s4670_s4, 512 }
 0x62f   : > { %p3889_p13 = scmp.ne.s32.totalorder %s4622_s8, %s3888_s10  ;;  %p3893_p4 = scmp.lt.u32.totalorder %s4622_s8, %s4670_s4 }
 0x630   : > { %p3894_p7 = scmp.lt.u32.totalorder %s3892_s20, %s3888_s10  ;;  %p3896_p8 = scmp.lt.u32.totalorder %s3888_s10, %s4622_s8 }
 0x631   : > { %p3890_p6 = pnand %p3889_p13, %p4684_p0 }
 0x632   : > { %p3895_p11 = por %p3894_p7, %p3893_p4 }
 0x633   : > { %p3891_p10 = pneg %p3890_p6 }
 0x634   : > { %p3897_p2 = por %p3896_p8, %p3895_p11 }
 0x636   : > { %p3898_p3 = pnand %p3897_p2, %p3891_p10 }
 0x638   : > { %3901 = shalt.err (!%p3898_p3)
}
 0x639   : > { %3635 = dma.vmem_to_hbm [thread:$0]  (%p4684_p0), %s4624_s12, 256, %s4622_s8, %s3427_s9  }
 0x63a PF: > { %s3453_s23 = sand.u32 1, %s3932_s15   ;;  %p4685_p5 = scmp.ne.s32.totalorder %s4675_s22, 0 }
 0x63b   : > { %p4686_p9 = scmp.ge.s32.totalorder %s3944_s18, 2  ;;  %s3454_s21 = scalar_lea.sflag [#allocation4], %s3453_s23 }
 0x63d   : > { %p3649_p12 = pnand %p4686_p9, %p4685_p5 }
 0x63f   : > { %3927 = dma.done.wait (!%p3649_p12), %s3454_s21, 256  }
 0x640   : > { %3929 = vsyncadd (!%p3649_p12), %s3454_s21, 4294967040  ;;  %p18_p1 = scmp.ge.s32.totalorder %s4102_s13, 4   ;;  %s4687_s15 = smov %s3936_s16 }
 0x641   : > { %s4688_s16 = smov %s3940_s17  ;;  %s4689_s17 = smov %s4111_s24 }
 0x642   : > { %s4690_s18 = smov %s4102_s13  ;;  %20 = sbr.rel (!%p18_p1) target bundleno = 6 (0x6), region = 134 }
 0x649   :  { %3459 = vsyncpa [#allocation3], 1 }
 0x64a   :  { %3461 = vsyncpa [#allocation3 + $0x1], 1 }
 0x64b   :  { %3462 = vsyncpa [#allocation6], 1 }
 0x64c   :  { %3463 = vsyncpa [#allocation4], 1 }
 0x64d   :  { %3465 = vsyncpa [#allocation4 + $0x1], 1 }

</bundles_post_ra>
